<compile_context>
chip_gen: v7x
topology: tpu7x:2x2x1
jax: 0.10.0
libtpu: 0.0.40
codegen_flags: <defaults>
</compile_context>

<pallas_src>
import functools

import jax
import jax.numpy as jnp
from jax import lax
from jax.experimental import pallas as pl
from jax.experimental.pallas import tpu as pltpu


def _roll(v, shift, axis):
    """Static circular roll (jnp.roll semantics) on the XLU; no-op if 0."""
    shift = shift % v.shape[axis]
    if shift == 0:
        return v
    return pltpu.roll(v, shift, axis)


def _basic_block_kernel(C, N, W, x_ref, aux_ref, o_ref):
    # x_ref  : (H, C*N*W) packed input, lane = (c*N + n)*W + w
    # aux_ref: (R, C*N*W) per-lane constants:
    #            rows [0, 9C)        conv1 tap weights, (dh, dw, d) order
    #            rows [9C, 18C)      conv2 tap weights
    #            rows 18C .. 18C+3   bn1 scale, bn1 bias, bn2 scale, bn2 bias
    # o_ref  : (H, C*N*W) packed output
    H = x_ref.shape[0]
    NW = N * W
    n_taps = 9 * C

    def wrow(i):                                # (1, L) per-lane constant row
        return aux_ref[i:i + 1, :]

    x = x_ref[...].astype(jnp.float32)

    def conv3x3(p, base):
        # out[co,h,w] = sum_{dh,dw,ci} Wt[dh+1,dw+1,ci,co]
        #                 * p[ci, (h+dh) mod H, w+dw]   (zero if w+dw outside)
        acc = jnp.zeros_like(p)
        idx = base
        for dh in (-1, 0, 1):
            s = _roll(p, -dh, 0)                # circular-H halo (sublane roll)
            for dw in (-1, 0, 1):
                for d in range(C):              # ci = (co - d) mod C
                    r = _roll(s, d * NW - dw, 1)  # channel-offset + W shift
                    acc = acc + r * wrow(idx)     # invalid W cols already 0 in wrow
                    idx += 1
        return acc

    # conv1 -> bn1 -> relu
    h = conv3x3(x, 0)
    h = jnp.maximum(h * wrow(2 * n_taps) + wrow(2 * n_taps + 1), 0.0)
    # conv2 -> bn2 -> (+ identity residual) -> relu; one full-width store.
    h = conv3x3(h, n_taps)
    h = h * wrow(2 * n_taps + 2) + wrow(2 * n_taps + 3) + x
    o_ref[...] = jnp.maximum(h, 0.0).astype(o_ref.dtype)


def _build_aux(params, C, N, W):
    """Per-lane constant rows: conv tap weights (with the zero-W-padding mask
    folded in) and folded-BN scale/bias, in packed lane order (c*N+n)*W+w."""
    L = C * N * W
    lane = jnp.arange(L)
    co = lane // (N * W)           # output channel owning this lane
    wl = lane % W                  # w coordinate of this lane
    rows = []
    for w_hwio in (params["w1"], params["w2"]):     # (3, 3, Cin, Cout) HWIO
        for dh in (-1, 0, 1):
            for dw in (-1, 0, 1):
                for d in range(C):
                    ci = (co - d) % C
                    vals = w_hwio[dh + 1, dw + 1, ci, co].astype(jnp.float32)
                    valid = (wl + dw >= 0) & (wl + dw < W)
                    rows.append(jnp.where(valid, vals, 0.0))
    for v in (params["s1"], params["b1"], params["s2"], params["b2"]):
        rows.append(v[co].astype(jnp.float32))
    rows.extend([jnp.zeros((L,), jnp.float32)] * ((-len(rows)) % 8))
    return jnp.stack(rows)         # (R, L), R a multiple of 8


def basic_block_forward(x, params, *, stride=1):
    """Pallas forward of BasicBlock. x: (N, Cin, H, W) float32 (NCHW)."""
    # TODO(synk): stride != 1 and the optional `down_sample` submodule (an
    # arbitrary nn.Module in the reference code) are not implemented; this
    # covers the identity-residual configuration (stride=1, Cin == Cout).
    assert stride == 1
    N, Cin, H, W = x.shape
    Cout = params["w1"].shape[-1]
    assert Cin == Cout
    C = Cout
    L = C * N * W

    # Lane-dense packing (layout plumbing only): (N,C,H,W) -> (H, C*N*W).
    xp = jnp.transpose(x, (2, 1, 0, 3)).reshape(H, L)
    aux = _build_aux(params, C, N, W)

    kernel = functools.partial(_basic_block_kernel, C, N, W)
    out_packed = pl.pallas_call(
        kernel,
        out_shape=jax.ShapeDtypeStruct((H, L), x.dtype),
        grid_spec=pltpu.PrefetchScalarGridSpec(
            num_scalar_prefetch=0,
            grid=(1,),   # whole batch in one step; working set ~50 KB
            # TODO(synk): for realistic decoder sizes on v7x, split a batch or
            # spatial axis into a "parallel" grid dim so both TensorCores work,
            # and re-derive tiling for the 64 MiB VMEM budget.
            in_specs=[
                pl.BlockSpec((H, L), lambda i: (0, 0)),
                pl.BlockSpec(aux.shape, lambda i: (0, 0)),
            ],
            out_specs=pl.BlockSpec((H, L), lambda i: (0, 0)),
        ),
        compiler_params=pltpu.CompilerParams(
            dimension_semantics=("arbitrary",)),
    )(xp, aux)

    # Unpack (H, C*N*W) -> NCHW.
    return out_packed.reshape(H, C, N, W).transpose(2, 1, 0, 3)


def basic_block_reference(x, params):
    """Pure-JAX reference (matches the PyTorch forward, inference-mode BN)."""
    def circ_pad_h(t):
        return jnp.concatenate([t[:, :, -1:, :], t, t[:, :, :1, :]], axis=2)

    def conv(t, w_hwio):
        w_oihw = jnp.transpose(w_hwio, (3, 2, 0, 1))
        return lax.conv_general_dilated(
            circ_pad_h(t), w_oihw, window_strides=(1, 1),
            padding=((0, 0), (1, 1)),
            dimension_numbers=("NCHW", "OIHW", "NCHW"))

    h = conv(x, params["w1"])
    h = h * params["s1"][None, :, None, None] + params["b1"][None, :, None, None]
    h = jnp.maximum(h, 0.0)
    h = conv(h, params["w2"])
    h = h * params["s2"][None, :, None, None] + params["b2"][None, :, None, None]
    return jnp.maximum(h + x, 0.0)


if __name__ == "__main__":
    key = jax.random.PRNGKey(0)
    N, C, H, W = 2, 4, 16, 16
    k_x, k_w1, k_w2 = jax.random.split(key, 3)
    x = jax.random.normal(k_x, (N, C, H, W), dtype=jnp.float32)

    # Conv weights: generated in PyTorch OIHW layout, stored as HWIO.
    w1 = jnp.transpose(0.1 * jax.random.normal(k_w1, (C, C, 3, 3), jnp.float32),
                       (2, 3, 1, 0))
    w2 = jnp.transpose(0.1 * jax.random.normal(k_w2, (C, C, 3, 3), jnp.float32),
                       (2, 3, 1, 0))

    # Deterministic BatchNorm2d params, folded:  y = s * x + b
    eps = 1e-5
    ar = jnp.arange(C, dtype=jnp.float32)
    g1, be1, m1, v1 = 1.0 + 0.1 * ar, 0.05 * ar, 0.01 * ar, 1.0 + 0.02 * ar
    g2, be2, m2, v2 = 1.0 - 0.05 * ar, -0.03 * ar, 0.02 * ar, 1.0 + 0.01 * ar
    s1 = g1 / jnp.sqrt(v1 + eps)
    b1 = be1 - m1 * s1
    s2 = g2 / jnp.sqrt(v2 + eps)
    b2 = be2 - m2 * s2

    params = dict(w1=w1, s1=s1, b1=b1, w2=w2, s2=s2, b2=b2)

    out = jax.block_until_ready(basic_block_forward(x, params))
    ref = basic_block_reference(x, params)
    assert out.shape == (N, C, H, W) and out.dtype == x.dtype
    err = float(jnp.max(jnp.abs(out - ref)))
    assert err < 1e-4, f"mismatch vs reference: {err}"
    print("KERNEL_OK")
</pallas_src>

<mosaic_0001>
module attributes {stable_mosaic.version = 11 : i64} {
  func.func @_basic_block_kernel(%arg0: i32, %arg1: memref<16x128xf32, #tpu.memory_space<vmem>>, %arg2: memref<80x128xf32, #tpu.memory_space<vmem>>, %arg3: memref<16x128xf32, #tpu.memory_space<vmem>>) attributes {dimension_semantics = [#tpu.dimension_semantics<arbitrary>], iteration_bounds = array<i64: 1>, scalar_prefetch = 0 : i64, scratch_operands = 0 : i64, tpu.core_type = #tpu.core_type<tc>, window_params = [{pipeline_mode = #tpu.pipeline_mode<synchronous>, transform_indices = @transform_0, window_bounds = array<i64: 16, 128>}, {pipeline_mode = #tpu.pipeline_mode<synchronous>, transform_indices = @transform_1, window_bounds = array<i64: 80, 128>}, {pipeline_mode = #tpu.pipeline_mode<synchronous>, transform_indices = @transform_2, window_bounds = array<i64: 16, 128>}]} {
    %c0 = arith.constant 0 : index
    %c0_0 = arith.constant 0 : index
    %0 = vector.load %arg1[%c0, %c0_0] : memref<16x128xf32, #tpu.memory_space<vmem>>, vector<16x128xf32>
    %cst = arith.constant 0.000000e+00 : f32
    %1 = vector.broadcast %cst : f32 to vector<16x128xf32>
    %c1_i32 = arith.constant 1 : i32
    %2 = tpu.dynamic_rotate %0 by %c1_i32 dim 0 : vector<16x128xf32>, i32 -> vector<16x128xf32>
    %c1_i32_1 = arith.constant 1 : i32
    %3 = tpu.dynamic_rotate %2 by %c1_i32_1 dim 1 : vector<16x128xf32>, i32 -> vector<16x128xf32>
    %c0_2 = arith.constant 0 : index
    %c0_3 = arith.constant 0 : index
    %4 = vector.load %arg2[%c0_2, %c0_3] : memref<80x128xf32, #tpu.memory_space<vmem>>, vector<1x128xf32>
    %5 = vector.broadcast %4 : vector<1x128xf32> to vector<16x128xf32>
    %6 = arith.mulf %3, %5 : vector<16x128xf32>
    %7 = arith.addf %1, %6 : vector<16x128xf32>
    %c33_i32 = arith.constant 33 : i32
    %8 = tpu.dynamic_rotate %2 by %c33_i32 dim 1 : vector<16x128xf32>, i32 -> vector<16x128xf32>
    %c1 = arith.constant 1 : index
    %c0_4 = arith.constant 0 : index
    %9 = vector.load %arg2[%c1, %c0_4] : memref<80x128xf32, #tpu.memory_space<vmem>>, vector<1x128xf32>
    %10 = vector.broadcast %9 : vector<1x128xf32> to vector<16x128xf32>
    %11 = arith.mulf %8, %10 : vector<16x128xf32>
    %12 = arith.addf %7, %11 : vector<16x128xf32>
    %c65_i32 = arith.constant 65 : i32
    %13 = tpu.dynamic_rotate %2 by %c65_i32 dim 1 : vector<16x128xf32>, i32 -> vector<16x128xf32>
    %c2 = arith.constant 2 : index
    %c0_5 = arith.constant 0 : index
    %14 = vector.load %arg2[%c2, %c0_5] : memref<80x128xf32, #tpu.memory_space<vmem>>, vector<1x128xf32>
    %15 = vector.broadcast %14 : vector<1x128xf32> to vector<16x128xf32>
    %16 = arith.mulf %13, %15 : vector<16x128xf32>
    %17 = arith.addf %12, %16 : vector<16x128xf32>
    %c97_i32 = arith.constant 97 : i32
    %18 = tpu.dynamic_rotate %2 by %c97_i32 dim 1 : vector<16x128xf32>, i32 -> vector<16x128xf32>
    %c3 = arith.constant 3 : index
    %c0_6 = arith.constant 0 : index
    %19 = vector.load %arg2[%c3, %c0_6] : memref<80x128xf32, #tpu.memory_space<vmem>>, vector<1x128xf32>
    %20 = vector.broadcast %19 : vector<1x128xf32> to vector<16x128xf32>
    %21 = arith.mulf %18, %20 : vector<16x128xf32>
    %22 = arith.addf %17, %21 : vector<16x128xf32>
    %c4 = arith.constant 4 : index
    %c0_7 = arith.constant 0 : index
    %23 = vector.load %arg2[%c4, %c0_7] : memref<80x128xf32, #tpu.memory_space<vmem>>, vector<1x128xf32>
    %24 = vector.broadcast %23 : vector<1x128xf32> to vector<16x128xf32>
    %25 = arith.mulf %2, %24 : vector<16x128xf32>
    %26 = arith.addf %22, %25 : vector<16x128xf32>
    %c32_i32 = arith.constant 32 : i32
    %27 = tpu.dynamic_rotate %2 by %c32_i32 dim 1 : vector<16x128xf32>, i32 -> vector<16x128xf32>
    %c5 = arith.constant 5 : index
    %c0_8 = arith.constant 0 : index
    %28 = vector.load %arg2[%c5, %c0_8] : memref<80x128xf32, #tpu.memory_space<vmem>>, vector<1x128xf32>
    %29 = vector.broadcast %28 : vector<1x128xf32> to vector<16x128xf32>
    %30 = arith.mulf %27, %29 : vector<16x128xf32>
    %31 = arith.addf %26, %30 : vector<16x128xf32>
    %c64_i32 = arith.constant 64 : i32
    %32 = tpu.dynamic_rotate %2 by %c64_i32 dim 1 : vector<16x128xf32>, i32 -> vector<16x128xf32>
    %c6 = arith.constant 6 : index
    %c0_9 = arith.constant 0 : index
    %33 = vector.load %arg2[%c6, %c0_9] : memref<80x128xf32, #tpu.memory_space<vmem>>, vector<1x128xf32>
    %34 = vector.broadcast %33 : vector<1x128xf32> to vector<16x128xf32>
    %35 = arith.mulf %32, %34 : vector<16x128xf32>
    %36 = arith.addf %31, %35 : vector<16x128xf32>
    %c96_i32 = arith.constant 96 : i32
    %37 = tpu.dynamic_rotate %2 by %c96_i32 dim 1 : vector<16x128xf32>, i32 -> vector<16x128xf32>
    %c7 = arith.constant 7 : index
    %c0_10 = arith.constant 0 : index
    %38 = vector.load %arg2[%c7, %c0_10] : memref<80x128xf32, #tpu.memory_space<vmem>>, vector<1x128xf32>
    %39 = vector.broadcast %38 : vector<1x128xf32> to vector<16x128xf32>
    %40 = arith.mulf %37, %39 : vector<16x128xf32>
    %41 = arith.addf %36, %40 : vector<16x128xf32>
    %c127_i32 = arith.constant 127 : i32
    %42 = tpu.dynamic_rotate %2 by %c127_i32 dim 1 : vector<16x128xf32>, i32 -> vector<16x128xf32>
    %c8 = arith.constant 8 : index
    %c0_11 = arith.constant 0 : index
    %43 = vector.load %arg2[%c8, %c0_11] : memref<80x128xf32, #tpu.memory_space<vmem>>, vector<1x128xf32>
    %44 = vector.broadcast %43 : vector<1x128xf32> to vector<16x128xf32>
    %45 = arith.mulf %42, %44 : vector<16x128xf32>
    %46 = arith.addf %41, %45 : vector<16x128xf32>
    %c31_i32 = arith.constant 31 : i32
    %47 = tpu.dynamic_rotate %2 by %c31_i32 dim 1 : vector<16x128xf32>, i32 -> vector<16x128xf32>
    %c9 = arith.constant 9 : index
    %c0_12 = arith.constant 0 : index
    %48 = vector.load %arg2[%c9, %c0_12] : memref<80x128xf32, #tpu.memory_space<vmem>>, vector<1x128xf32>
    %49 = vector.broadcast %48 : vector<1x128xf32> to vector<16x128xf32>
    %50 = arith.mulf %47, %49 : vector<16x128xf32>
    %51 = arith.addf %46, %50 : vector<16x128xf32>
    %c63_i32 = arith.constant 63 : i32
    %52 = tpu.dynamic_rotate %2 by %c63_i32 dim 1 : vector<16x128xf32>, i32 -> vector<16x128xf32>
    %c10 = arith.constant 10 : index
    %c0_13 = arith.constant 0 : index
    %53 = vector.load %arg2[%c10, %c0_13] : memref<80x128xf32, #tpu.memory_space<vmem>>, vector<1x128xf32>
    %54 = vector.broadcast %53 : vector<1x128xf32> to vector<16x128xf32>
    %55 = arith.mulf %52, %54 : vector<16x128xf32>
    %56 = arith.addf %51, %55 : vector<16x128xf32>
    %c95_i32 = arith.constant 95 : i32
    %57 = tpu.dynamic_rotate %2 by %c95_i32 dim 1 : vector<16x128xf32>, i32 -> vector<16x128xf32>
    %c11 = arith.constant 11 : index
    %c0_14 = arith.constant 0 : index
    %58 = vector.load %arg2[%c11, %c0_14] : memref<80x128xf32, #tpu.memory_space<vmem>>, vector<1x128xf32>
    %59 = vector.broadcast %58 : vector<1x128xf32> to vector<16x128xf32>
    %60 = arith.mulf %57, %59 : vector<16x128xf32>
    %61 = arith.addf %56, %60 : vector<16x128xf32>
    %c1_i32_15 = arith.constant 1 : i32
    %62 = tpu.dynamic_rotate %0 by %c1_i32_15 dim 1 : vector<16x128xf32>, i32 -> vector<16x128xf32>
    %c12 = arith.constant 12 : index
    %c0_16 = arith.constant 0 : index
    %63 = vector.load %arg2[%c12, %c0_16] : memref<80x128xf32, #tpu.memory_space<vmem>>, vector<1x128xf32>
    %64 = vector.broadcast %63 : vector<1x128xf32> to vector<16x128xf32>
    %65 = arith.mulf %62, %64 : vector<16x128xf32>
    %66 = arith.addf %61, %65 : vector<16x128xf32>
    %c33_i32_17 = arith.constant 33 : i32
    %67 = tpu.dynamic_rotate %0 by %c33_i32_17 dim 1 : vector<16x128xf32>, i32 -> vector<16x128xf32>
    %c13 = arith.constant 13 : index
    %c0_18 = arith.constant 0 : index
    %68 = vector.load %arg2[%c13, %c0_18] : memref<80x128xf32, #tpu.memory_space<vmem>>, vector<1x128xf32>
    %69 = vector.broadcast %68 : vector<1x128xf32> to vector<16x128xf32>
    %70 = arith.mulf %67, %69 : vector<16x128xf32>
    %71 = arith.addf %66, %70 : vector<16x128xf32>
    %c65_i32_19 = arith.constant 65 : i32
    %72 = tpu.dynamic_rotate %0 by %c65_i32_19 dim 1 : vector<16x128xf32>, i32 -> vector<16x128xf32>
    %c14 = arith.constant 14 : index
    %c0_20 = arith.constant 0 : index
    %73 = vector.load %arg2[%c14, %c0_20] : memref<80x128xf32, #tpu.memory_space<vmem>>, vector<1x128xf32>
    %74 = vector.broadcast %73 : vector<1x128xf32> to vector<16x128xf32>
    %75 = arith.mulf %72, %74 : vector<16x128xf32>
    %76 = arith.addf %71, %75 : vector<16x128xf32>
    %c97_i32_21 = arith.constant 97 : i32
    %77 = tpu.dynamic_rotate %0 by %c97_i32_21 dim 1 : vector<16x128xf32>, i32 -> vector<16x128xf32>
    %c15 = arith.constant 15 : index
    %c0_22 = arith.constant 0 : index
    %78 = vector.load %arg2[%c15, %c0_22] : memref<80x128xf32, #tpu.memory_space<vmem>>, vector<1x128xf32>
    %79 = vector.broadcast %78 : vector<1x128xf32> to vector<16x128xf32>
    %80 = arith.mulf %77, %79 : vector<16x128xf32>
    %81 = arith.addf %76, %80 : vector<16x128xf32>
    %c16 = arith.constant 16 : index
    %c0_23 = arith.constant 0 : index
    %82 = vector.load %arg2[%c16, %c0_23] : memref<80x128xf32, #tpu.memory_space<vmem>>, vector<1x128xf32>
    %83 = vector.broadcast %82 : vector<1x128xf32> to vector<16x128xf32>
    %84 = arith.mulf %0, %83 : vector<16x128xf32>
    %85 = arith.addf %81, %84 : vector<16x128xf32>
    %c32_i32_24 = arith.constant 32 : i32
    %86 = tpu.dynamic_rotate %0 by %c32_i32_24 dim 1 : vector<16x128xf32>, i32 -> vector<16x128xf32>
    %c17 = arith.constant 17 : index
    %c0_25 = arith.constant 0 : index
    %87 = vector.load %arg2[%c17, %c0_25] : memref<80x128xf32, #tpu.memory_space<vmem>>, vector<1x128xf32>
    %88 = vector.broadcast %87 : vector<1x128xf32> to vector<16x128xf32>
    %89 = arith.mulf %86, %88 : vector<16x128xf32>
    %90 = arith.addf %85, %89 : vector<16x128xf32>
    %c64_i32_26 = arith.constant 64 : i32
    %91 = tpu.dynamic_rotate %0 by %c64_i32_26 dim 1 : vector<16x128xf32>, i32 -> vector<16x128xf32>
    %c18 = arith.constant 18 : index
    %c0_27 = arith.constant 0 : index
    %92 = vector.load %arg2[%c18, %c0_27] : memref<80x128xf32, #tpu.memory_space<vmem>>, vector<1x128xf32>
    %93 = vector.broadcast %92 : vector<1x128xf32> to vector<16x128xf32>
    %94 = arith.mulf %91, %93 : vector<16x128xf32>
    %95 = arith.addf %90, %94 : vector<16x128xf32>
    %c96_i32_28 = arith.constant 96 : i32
    %96 = tpu.dynamic_rotate %0 by %c96_i32_28 dim 1 : vector<16x128xf32>, i32 -> vector<16x128xf32>
    %c19 = arith.constant 19 : index
    %c0_29 = arith.constant 0 : index
    %97 = vector.load %arg2[%c19, %c0_29] : memref<80x128xf32, #tpu.memory_space<vmem>>, vector<1x128xf32>
    %98 = vector.broadcast %97 : vector<1x128xf32> to vector<16x128xf32>
    %99 = arith.mulf %96, %98 : vector<16x128xf32>
    %100 = arith.addf %95, %99 : vector<16x128xf32>
    %c127_i32_30 = arith.constant 127 : i32
    %101 = tpu.dynamic_rotate %0 by %c127_i32_30 dim 1 : vector<16x128xf32>, i32 -> vector<16x128xf32>
    %c20 = arith.constant 20 : index
    %c0_31 = arith.constant 0 : index
    %102 = vector.load %arg2[%c20, %c0_31] : memref<80x128xf32, #tpu.memory_space<vmem>>, vector<1x128xf32>
    %103 = vector.broadcast %102 : vector<1x128xf32> to vector<16x128xf32>
    %104 = arith.mulf %101, %103 : vector<16x128xf32>
    %105 = arith.addf %100, %104 : vector<16x128xf32>
    %c31_i32_32 = arith.constant 31 : i32
    %106 = tpu.dynamic_rotate %0 by %c31_i32_32 dim 1 : vector<16x128xf32>, i32 -> vector<16x128xf32>
    %c21 = arith.constant 21 : index
    %c0_33 = arith.constant 0 : index
    %107 = vector.load %arg2[%c21, %c0_33] : memref<80x128xf32, #tpu.memory_space<vmem>>, vector<1x128xf32>
    %108 = vector.broadcast %107 : vector<1x128xf32> to vector<16x128xf32>
    %109 = arith.mulf %106, %108 : vector<16x128xf32>
    %110 = arith.addf %105, %109 : vector<16x128xf32>
    %c63_i32_34 = arith.constant 63 : i32
    %111 = tpu.dynamic_rotate %0 by %c63_i32_34 dim 1 : vector<16x128xf32>, i32 -> vector<16x128xf32>
    %c22 = arith.constant 22 : index
    %c0_35 = arith.constant 0 : index
    %112 = vector.load %arg2[%c22, %c0_35] : memref<80x128xf32, #tpu.memory_space<vmem>>, vector<1x128xf32>
    %113 = vector.broadcast %112 : vector<1x128xf32> to vector<16x128xf32>
    %114 = arith.mulf %111, %113 : vector<16x128xf32>
    %115 = arith.addf %110, %114 : vector<16x128xf32>
    %c95_i32_36 = arith.constant 95 : i32
    %116 = tpu.dynamic_rotate %0 by %c95_i32_36 dim 1 : vector<16x128xf32>, i32 -> vector<16x128xf32>
    %c23 = arith.constant 23 : index
    %c0_37 = arith.constant 0 : index
    %117 = vector.load %arg2[%c23, %c0_37] : memref<80x128xf32, #tpu.memory_space<vmem>>, vector<1x128xf32>
    %118 = vector.broadcast %117 : vector<1x128xf32> to vector<16x128xf32>
    %119 = arith.mulf %116, %118 : vector<16x128xf32>
    %120 = arith.addf %115, %119 : vector<16x128xf32>
    %c15_i32 = arith.constant 15 : i32
    %121 = tpu.dynamic_rotate %0 by %c15_i32 dim 0 : vector<16x128xf32>, i32 -> vector<16x128xf32>
    %c1_i32_38 = arith.constant 1 : i32
    %122 = tpu.dynamic_rotate %121 by %c1_i32_38 dim 1 : vector<16x128xf32>, i32 -> vector<16x128xf32>
    %c24 = arith.constant 24 : index
    %c0_39 = arith.constant 0 : index
    %123 = vector.load %arg2[%c24, %c0_39] : memref<80x128xf32, #tpu.memory_space<vmem>>, vector<1x128xf32>
    %124 = vector.broadcast %123 : vector<1x128xf32> to vector<16x128xf32>
    %125 = arith.mulf %122, %124 : vector<16x128xf32>
    %126 = arith.addf %120, %125 : vector<16x128xf32>
    %c33_i32_40 = arith.constant 33 : i32
    %127 = tpu.dynamic_rotate %121 by %c33_i32_40 dim 1 : vector<16x128xf32>, i32 -> vector<16x128xf32>
    %c25 = arith.constant 25 : index
    %c0_41 = arith.constant 0 : index
    %128 = vector.load %arg2[%c25, %c0_41] : memref<80x128xf32, #tpu.memory_space<vmem>>, vector<1x128xf32>
    %129 = vector.broadcast %128 : vector<1x128xf32> to vector<16x128xf32>
    %130 = arith.mulf %127, %129 : vector<16x128xf32>
    %131 = arith.addf %126, %130 : vector<16x128xf32>
    %c65_i32_42 = arith.constant 65 : i32
    %132 = tpu.dynamic_rotate %121 by %c65_i32_42 dim 1 : vector<16x128xf32>, i32 -> vector<16x128xf32>
    %c26 = arith.constant 26 : index
    %c0_43 = arith.constant 0 : index
    %133 = vector.load %arg2[%c26, %c0_43] : memref<80x128xf32, #tpu.memory_space<vmem>>, vector<1x128xf32>
    %134 = vector.broadcast %133 : vector<1x128xf32> to vector<16x128xf32>
    %135 = arith.mulf %132, %134 : vector<16x128xf32>
    %136 = arith.addf %131, %135 : vector<16x128xf32>
    %c97_i32_44 = arith.constant 97 : i32
    %137 = tpu.dynamic_rotate %121 by %c97_i32_44 dim 1 : vector<16x128xf32>, i32 -> vector<16x128xf32>
    %c27 = arith.constant 27 : index
    %c0_45 = arith.constant 0 : index
    %138 = vector.load %arg2[%c27, %c0_45] : memref<80x128xf32, #tpu.memory_space<vmem>>, vector<1x128xf32>
    %139 = vector.broadcast %138 : vector<1x128xf32> to vector<16x128xf32>
    %140 = arith.mulf %137, %139 : vector<16x128xf32>
    %141 = arith.addf %136, %140 : vector<16x128xf32>
    %c28 = arith.constant 28 : index
    %c0_46 = arith.constant 0 : index
    %142 = vector.load %arg2[%c28, %c0_46] : memref<80x128xf32, #tpu.memory_space<vmem>>, vector<1x128xf32>
    %143 = vector.broadcast %142 : vector<1x128xf32> to vector<16x128xf32>
    %144 = arith.mulf %121, %143 : vector<16x128xf32>
    %145 = arith.addf %141, %144 : vector<16x128xf32>
    %c32_i32_47 = arith.constant 32 : i32
    %146 = tpu.dynamic_rotate %121 by %c32_i32_47 dim 1 : vector<16x128xf32>, i32 -> vector<16x128xf32>
    %c29 = arith.constant 29 : index
    %c0_48 = arith.constant 0 : index
    %147 = vector.load %arg2[%c29, %c0_48] : memref<80x128xf32, #tpu.memory_space<vmem>>, vector<1x128xf32>
    %148 = vector.broadcast %147 : vector<1x128xf32> to vector<16x128xf32>
    %149 = arith.mulf %146, %148 : vector<16x128xf32>
    %150 = arith.addf %145, %149 : vector<16x128xf32>
    %c64_i32_49 = arith.constant 64 : i32
    %151 = tpu.dynamic_rotate %121 by %c64_i32_49 dim 1 : vector<16x128xf32>, i32 -> vector<16x128xf32>
    %c30 = arith.constant 30 : index
    %c0_50 = arith.constant 0 : index
    %152 = vector.load %arg2[%c30, %c0_50] : memref<80x128xf32, #tpu.memory_space<vmem>>, vector<1x128xf32>
    %153 = vector.broadcast %152 : vector<1x128xf32> to vector<16x128xf32>
    %154 = arith.mulf %151, %153 : vector<16x128xf32>
    %155 = arith.addf %150, %154 : vector<16x128xf32>
    %c96_i32_51 = arith.constant 96 : i32
    %156 = tpu.dynamic_rotate %121 by %c96_i32_51 dim 1 : vector<16x128xf32>, i32 -> vector<16x128xf32>
    %c31 = arith.constant 31 : index
    %c0_52 = arith.constant 0 : index
    %157 = vector.load %arg2[%c31, %c0_52] : memref<80x128xf32, #tpu.memory_space<vmem>>, vector<1x128xf32>
    %158 = vector.broadcast %157 : vector<1x128xf32> to vector<16x128xf32>
    %159 = arith.mulf %156, %158 : vector<16x128xf32>
    %160 = arith.addf %155, %159 : vector<16x128xf32>
    %c127_i32_53 = arith.constant 127 : i32
    %161 = tpu.dynamic_rotate %121 by %c127_i32_53 dim 1 : vector<16x128xf32>, i32 -> vector<16x128xf32>
    %c32 = arith.constant 32 : index
    %c0_54 = arith.constant 0 : index
    %162 = vector.load %arg2[%c32, %c0_54] : memref<80x128xf32, #tpu.memory_space<vmem>>, vector<1x128xf32>
    %163 = vector.broadcast %162 : vector<1x128xf32> to vector<16x128xf32>
    %164 = arith.mulf %161, %163 : vector<16x128xf32>
    %165 = arith.addf %160, %164 : vector<16x128xf32>
    %c31_i32_55 = arith.constant 31 : i32
    %166 = tpu.dynamic_rotate %121 by %c31_i32_55 dim 1 : vector<16x128xf32>, i32 -> vector<16x128xf32>
    %c33 = arith.constant 33 : index
    %c0_56 = arith.constant 0 : index
    %167 = vector.load %arg2[%c33, %c0_56] : memref<80x128xf32, #tpu.memory_space<vmem>>, vector<1x128xf32>
    %168 = vector.broadcast %167 : vector<1x128xf32> to vector<16x128xf32>
    %169 = arith.mulf %166, %168 : vector<16x128xf32>
    %170 = arith.addf %165, %169 : vector<16x128xf32>
    %c63_i32_57 = arith.constant 63 : i32
    %171 = tpu.dynamic_rotate %121 by %c63_i32_57 dim 1 : vector<16x128xf32>, i32 -> vector<16x128xf32>
    %c34 = arith.constant 34 : index
    %c0_58 = arith.constant 0 : index
    %172 = vector.load %arg2[%c34, %c0_58] : memref<80x128xf32, #tpu.memory_space<vmem>>, vector<1x128xf32>
    %173 = vector.broadcast %172 : vector<1x128xf32> to vector<16x128xf32>
    %174 = arith.mulf %171, %173 : vector<16x128xf32>
    %175 = arith.addf %170, %174 : vector<16x128xf32>
    %c95_i32_59 = arith.constant 95 : i32
    %176 = tpu.dynamic_rotate %121 by %c95_i32_59 dim 1 : vector<16x128xf32>, i32 -> vector<16x128xf32>
    %c35 = arith.constant 35 : index
    %c0_60 = arith.constant 0 : index
    %177 = vector.load %arg2[%c35, %c0_60] : memref<80x128xf32, #tpu.memory_space<vmem>>, vector<1x128xf32>
    %178 = vector.broadcast %177 : vector<1x128xf32> to vector<16x128xf32>
    %179 = arith.mulf %176, %178 : vector<16x128xf32>
    %180 = arith.addf %175, %179 : vector<16x128xf32>
    %c72 = arith.constant 72 : index
    %c0_61 = arith.constant 0 : index
    %181 = vector.load %arg2[%c72, %c0_61] : memref<80x128xf32, #tpu.memory_space<vmem>>, vector<1x128xf32>
    %182 = vector.broadcast %181 : vector<1x128xf32> to vector<16x128xf32>
    %183 = arith.mulf %180, %182 : vector<16x128xf32>
    %c73 = arith.constant 73 : index
    %c0_62 = arith.constant 0 : index
    %184 = vector.load %arg2[%c73, %c0_62] : memref<80x128xf32, #tpu.memory_space<vmem>>, vector<1x128xf32>
    %185 = vector.broadcast %184 : vector<1x128xf32> to vector<16x128xf32>
    %186 = arith.addf %183, %185 : vector<16x128xf32>
    %cst_63 = arith.constant 0.000000e+00 : f32
    %187 = vector.broadcast %cst_63 : f32 to vector<16x128xf32>
    %188 = arith.maximumf %186, %187 : vector<16x128xf32>
    %cst_64 = arith.constant 0.000000e+00 : f32
    %189 = vector.broadcast %cst_64 : f32 to vector<16x128xf32>
    %c1_i32_65 = arith.constant 1 : i32
    %190 = tpu.dynamic_rotate %188 by %c1_i32_65 dim 0 : vector<16x128xf32>, i32 -> vector<16x128xf32>
    %c1_i32_66 = arith.constant 1 : i32
    %191 = tpu.dynamic_rotate %190 by %c1_i32_66 dim 1 : vector<16x128xf32>, i32 -> vector<16x128xf32>
    %c36 = arith.constant 36 : index
    %c0_67 = arith.constant 0 : index
    %192 = vector.load %arg2[%c36, %c0_67] : memref<80x128xf32, #tpu.memory_space<vmem>>, vector<1x128xf32>
    %193 = vector.broadcast %192 : vector<1x128xf32> to vector<16x128xf32>
    %194 = arith.mulf %191, %193 : vector<16x128xf32>
    %195 = arith.addf %189, %194 : vector<16x128xf32>
    %c33_i32_68 = arith.constant 33 : i32
    %196 = tpu.dynamic_rotate %190 by %c33_i32_68 dim 1 : vector<16x128xf32>, i32 -> vector<16x128xf32>
    %c37 = arith.constant 37 : index
    %c0_69 = arith.constant 0 : index
    %197 = vector.load %arg2[%c37, %c0_69] : memref<80x128xf32, #tpu.memory_space<vmem>>, vector<1x128xf32>
    %198 = vector.broadcast %197 : vector<1x128xf32> to vector<16x128xf32>
    %199 = arith.mulf %196, %198 : vector<16x128xf32>
    %200 = arith.addf %195, %199 : vector<16x128xf32>
    %c65_i32_70 = arith.constant 65 : i32
    %201 = tpu.dynamic_rotate %190 by %c65_i32_70 dim 1 : vector<16x128xf32>, i32 -> vector<16x128xf32>
    %c38 = arith.constant 38 : index
    %c0_71 = arith.constant 0 : index
    %202 = vector.load %arg2[%c38, %c0_71] : memref<80x128xf32, #tpu.memory_space<vmem>>, vector<1x128xf32>
    %203 = vector.broadcast %202 : vector<1x128xf32> to vector<16x128xf32>
    %204 = arith.mulf %201, %203 : vector<16x128xf32>
    %205 = arith.addf %200, %204 : vector<16x128xf32>
    %c97_i32_72 = arith.constant 97 : i32
    %206 = tpu.dynamic_rotate %190 by %c97_i32_72 dim 1 : vector<16x128xf32>, i32 -> vector<16x128xf32>
    %c39 = arith.constant 39 : index
    %c0_73 = arith.constant 0 : index
    %207 = vector.load %arg2[%c39, %c0_73] : memref<80x128xf32, #tpu.memory_space<vmem>>, vector<1x128xf32>
    %208 = vector.broadcast %207 : vector<1x128xf32> to vector<16x128xf32>
    %209 = arith.mulf %206, %208 : vector<16x128xf32>
    %210 = arith.addf %205, %209 : vector<16x128xf32>
    %c40 = arith.constant 40 : index
    %c0_74 = arith.constant 0 : index
    %211 = vector.load %arg2[%c40, %c0_74] : memref<80x128xf32, #tpu.memory_space<vmem>>, vector<1x128xf32>
    %212 = vector.broadcast %211 : vector<1x128xf32> to vector<16x128xf32>
    %213 = arith.mulf %190, %212 : vector<16x128xf32>
    %214 = arith.addf %210, %213 : vector<16x128xf32>
    %c32_i32_75 = arith.constant 32 : i32
    %215 = tpu.dynamic_rotate %190 by %c32_i32_75 dim 1 : vector<16x128xf32>, i32 -> vector<16x128xf32>
    %c41 = arith.constant 41 : index
    %c0_76 = arith.constant 0 : index
    %216 = vector.load %arg2[%c41, %c0_76] : memref<80x128xf32, #tpu.memory_space<vmem>>, vector<1x128xf32>
    %217 = vector.broadcast %216 : vector<1x128xf32> to vector<16x128xf32>
    %218 = arith.mulf %215, %217 : vector<16x128xf32>
    %219 = arith.addf %214, %218 : vector<16x128xf32>
    %c64_i32_77 = arith.constant 64 : i32
    %220 = tpu.dynamic_rotate %190 by %c64_i32_77 dim 1 : vector<16x128xf32>, i32 -> vector<16x128xf32>
    %c42 = arith.constant 42 : index
    %c0_78 = arith.constant 0 : index
    %221 = vector.load %arg2[%c42, %c0_78] : memref<80x128xf32, #tpu.memory_space<vmem>>, vector<1x128xf32>
    %222 = vector.broadcast %221 : vector<1x128xf32> to vector<16x128xf32>
    %223 = arith.mulf %220, %222 : vector<16x128xf32>
    %224 = arith.addf %219, %223 : vector<16x128xf32>
    %c96_i32_79 = arith.constant 96 : i32
    %225 = tpu.dynamic_rotate %190 by %c96_i32_79 dim 1 : vector<16x128xf32>, i32 -> vector<16x128xf32>
    %c43 = arith.constant 43 : index
    %c0_80 = arith.constant 0 : index
    %226 = vector.load %arg2[%c43, %c0_80] : memref<80x128xf32, #tpu.memory_space<vmem>>, vector<1x128xf32>
    %227 = vector.broadcast %226 : vector<1x128xf32> to vector<16x128xf32>
    %228 = arith.mulf %225, %227 : vector<16x128xf32>
    %229 = arith.addf %224, %228 : vector<16x128xf32>
    %c127_i32_81 = arith.constant 127 : i32
    %230 = tpu.dynamic_rotate %190 by %c127_i32_81 dim 1 : vector<16x128xf32>, i32 -> vector<16x128xf32>
    %c44 = arith.constant 44 : index
    %c0_82 = arith.constant 0 : index
    %231 = vector.load %arg2[%c44, %c0_82] : memref<80x128xf32, #tpu.memory_space<vmem>>, vector<1x128xf32>
    %232 = vector.broadcast %231 : vector<1x128xf32> to vector<16x128xf32>
    %233 = arith.mulf %230, %232 : vector<16x128xf32>
    %234 = arith.addf %229, %233 : vector<16x128xf32>
    %c31_i32_83 = arith.constant 31 : i32
    %235 = tpu.dynamic_rotate %190 by %c31_i32_83 dim 1 : vector<16x128xf32>, i32 -> vector<16x128xf32>
    %c45 = arith.constant 45 : index
    %c0_84 = arith.constant 0 : index
    %236 = vector.load %arg2[%c45, %c0_84] : memref<80x128xf32, #tpu.memory_space<vmem>>, vector<1x128xf32>
    %237 = vector.broadcast %236 : vector<1x128xf32> to vector<16x128xf32>
    %238 = arith.mulf %235, %237 : vector<16x128xf32>
    %239 = arith.addf %234, %238 : vector<16x128xf32>
    %c63_i32_85 = arith.constant 63 : i32
    %240 = tpu.dynamic_rotate %190 by %c63_i32_85 dim 1 : vector<16x128xf32>, i32 -> vector<16x128xf32>
    %c46 = arith.constant 46 : index
    %c0_86 = arith.constant 0 : index
    %241 = vector.load %arg2[%c46, %c0_86] : memref<80x128xf32, #tpu.memory_space<vmem>>, vector<1x128xf32>
    %242 = vector.broadcast %241 : vector<1x128xf32> to vector<16x128xf32>
    %243 = arith.mulf %240, %242 : vector<16x128xf32>
    %244 = arith.addf %239, %243 : vector<16x128xf32>
    %c95_i32_87 = arith.constant 95 : i32
    %245 = tpu.dynamic_rotate %190 by %c95_i32_87 dim 1 : vector<16x128xf32>, i32 -> vector<16x128xf32>
    %c47 = arith.constant 47 : index
    %c0_88 = arith.constant 0 : index
    %246 = vector.load %arg2[%c47, %c0_88] : memref<80x128xf32, #tpu.memory_space<vmem>>, vector<1x128xf32>
    %247 = vector.broadcast %246 : vector<1x128xf32> to vector<16x128xf32>
    %248 = arith.mulf %245, %247 : vector<16x128xf32>
    %249 = arith.addf %244, %248 : vector<16x128xf32>
    %c1_i32_89 = arith.constant 1 : i32
    %250 = tpu.dynamic_rotate %188 by %c1_i32_89 dim 1 : vector<16x128xf32>, i32 -> vector<16x128xf32>
    %c48 = arith.constant 48 : index
    %c0_90 = arith.constant 0 : index
    %251 = vector.load %arg2[%c48, %c0_90] : memref<80x128xf32, #tpu.memory_space<vmem>>, vector<1x128xf32>
    %252 = vector.broadcast %251 : vector<1x128xf32> to vector<16x128xf32>
    %253 = arith.mulf %250, %252 : vector<16x128xf32>
    %254 = arith.addf %249, %253 : vector<16x128xf32>
    %c33_i32_91 = arith.constant 33 : i32
    %255 = tpu.dynamic_rotate %188 by %c33_i32_91 dim 1 : vector<16x128xf32>, i32 -> vector<16x128xf32>
    %c49 = arith.constant 49 : index
    %c0_92 = arith.constant 0 : index
    %256 = vector.load %arg2[%c49, %c0_92] : memref<80x128xf32, #tpu.memory_space<vmem>>, vector<1x128xf32>
    %257 = vector.broadcast %256 : vector<1x128xf32> to vector<16x128xf32>
    %258 = arith.mulf %255, %257 : vector<16x128xf32>
    %259 = arith.addf %254, %258 : vector<16x128xf32>
    %c65_i32_93 = arith.constant 65 : i32
    %260 = tpu.dynamic_rotate %188 by %c65_i32_93 dim 1 : vector<16x128xf32>, i32 -> vector<16x128xf32>
    %c50 = arith.constant 50 : index
    %c0_94 = arith.constant 0 : index
    %261 = vector.load %arg2[%c50, %c0_94] : memref<80x128xf32, #tpu.memory_space<vmem>>, vector<1x128xf32>
    %262 = vector.broadcast %261 : vector<1x128xf32> to vector<16x128xf32>
    %263 = arith.mulf %260, %262 : vector<16x128xf32>
    %264 = arith.addf %259, %263 : vector<16x128xf32>
    %c97_i32_95 = arith.constant 97 : i32
    %265 = tpu.dynamic_rotate %188 by %c97_i32_95 dim 1 : vector<16x128xf32>, i32 -> vector<16x128xf32>
    %c51 = arith.constant 51 : index
    %c0_96 = arith.constant 0 : index
    %266 = vector.load %arg2[%c51, %c0_96] : memref<80x128xf32, #tpu.memory_space<vmem>>, vector<1x128xf32>
    %267 = vector.broadcast %266 : vector<1x128xf32> to vector<16x128xf32>
    %268 = arith.mulf %265, %267 : vector<16x128xf32>
    %269 = arith.addf %264, %268 : vector<16x128xf32>
    %c52 = arith.constant 52 : index
    %c0_97 = arith.constant 0 : index
    %270 = vector.load %arg2[%c52, %c0_97] : memref<80x128xf32, #tpu.memory_space<vmem>>, vector<1x128xf32>
    %271 = vector.broadcast %270 : vector<1x128xf32> to vector<16x128xf32>
    %272 = arith.mulf %188, %271 : vector<16x128xf32>
    %273 = arith.addf %269, %272 : vector<16x128xf32>
    %c32_i32_98 = arith.constant 32 : i32
    %274 = tpu.dynamic_rotate %188 by %c32_i32_98 dim 1 : vector<16x128xf32>, i32 -> vector<16x128xf32>
    %c53 = arith.constant 53 : index
    %c0_99 = arith.constant 0 : index
    %275 = vector.load %arg2[%c53, %c0_99] : memref<80x128xf32, #tpu.memory_space<vmem>>, vector<1x128xf32>
    %276 = vector.broadcast %275 : vector<1x128xf32> to vector<16x128xf32>
    %277 = arith.mulf %274, %276 : vector<16x128xf32>
    %278 = arith.addf %273, %277 : vector<16x128xf32>
    %c64_i32_100 = arith.constant 64 : i32
    %279 = tpu.dynamic_rotate %188 by %c64_i32_100 dim 1 : vector<16x128xf32>, i32 -> vector<16x128xf32>
    %c54 = arith.constant 54 : index
    %c0_101 = arith.constant 0 : index
    %280 = vector.load %arg2[%c54, %c0_101] : memref<80x128xf32, #tpu.memory_space<vmem>>, vector<1x128xf32>
    %281 = vector.broadcast %280 : vector<1x128xf32> to vector<16x128xf32>
    %282 = arith.mulf %279, %281 : vector<16x128xf32>
    %283 = arith.addf %278, %282 : vector<16x128xf32>
    %c96_i32_102 = arith.constant 96 : i32
    %284 = tpu.dynamic_rotate %188 by %c96_i32_102 dim 1 : vector<16x128xf32>, i32 -> vector<16x128xf32>
    %c55 = arith.constant 55 : index
    %c0_103 = arith.constant 0 : index
    %285 = vector.load %arg2[%c55, %c0_103] : memref<80x128xf32, #tpu.memory_space<vmem>>, vector<1x128xf32>
    %286 = vector.broadcast %285 : vector<1x128xf32> to vector<16x128xf32>
    %287 = arith.mulf %284, %286 : vector<16x128xf32>
    %288 = arith.addf %283, %287 : vector<16x128xf32>
    %c127_i32_104 = arith.constant 127 : i32
    %289 = tpu.dynamic_rotate %188 by %c127_i32_104 dim 1 : vector<16x128xf32>, i32 -> vector<16x128xf32>
    %c56 = arith.constant 56 : index
    %c0_105 = arith.constant 0 : index
    %290 = vector.load %arg2[%c56, %c0_105] : memref<80x128xf32, #tpu.memory_space<vmem>>, vector<1x128xf32>
    %291 = vector.broadcast %290 : vector<1x128xf32> to vector<16x128xf32>
    %292 = arith.mulf %289, %291 : vector<16x128xf32>
    %293 = arith.addf %288, %292 : vector<16x128xf32>
    %c31_i32_106 = arith.constant 31 : i32
    %294 = tpu.dynamic_rotate %188 by %c31_i32_106 dim 1 : vector<16x128xf32>, i32 -> vector<16x128xf32>
    %c57 = arith.constant 57 : index
    %c0_107 = arith.constant 0 : index
    %295 = vector.load %arg2[%c57, %c0_107] : memref<80x128xf32, #tpu.memory_space<vmem>>, vector<1x128xf32>
    %296 = vector.broadcast %295 : vector<1x128xf32> to vector<16x128xf32>
    %297 = arith.mulf %294, %296 : vector<16x128xf32>
    %298 = arith.addf %293, %297 : vector<16x128xf32>
    %c63_i32_108 = arith.constant 63 : i32
    %299 = tpu.dynamic_rotate %188 by %c63_i32_108 dim 1 : vector<16x128xf32>, i32 -> vector<16x128xf32>
    %c58 = arith.constant 58 : index
    %c0_109 = arith.constant 0 : index
    %300 = vector.load %arg2[%c58, %c0_109] : memref<80x128xf32, #tpu.memory_space<vmem>>, vector<1x128xf32>
    %301 = vector.broadcast %300 : vector<1x128xf32> to vector<16x128xf32>
    %302 = arith.mulf %299, %301 : vector<16x128xf32>
    %303 = arith.addf %298, %302 : vector<16x128xf32>
    %c95_i32_110 = arith.constant 95 : i32
    %304 = tpu.dynamic_rotate %188 by %c95_i32_110 dim 1 : vector<16x128xf32>, i32 -> vector<16x128xf32>
    %c59 = arith.constant 59 : index
    %c0_111 = arith.constant 0 : index
    %305 = vector.load %arg2[%c59, %c0_111] : memref<80x128xf32, #tpu.memory_space<vmem>>, vector<1x128xf32>
    %306 = vector.broadcast %305 : vector<1x128xf32> to vector<16x128xf32>
    %307 = arith.mulf %304, %306 : vector<16x128xf32>
    %308 = arith.addf %303, %307 : vector<16x128xf32>
    %c15_i32_112 = arith.constant 15 : i32
    %309 = tpu.dynamic_rotate %188 by %c15_i32_112 dim 0 : vector<16x128xf32>, i32 -> vector<16x128xf32>
    %c1_i32_113 = arith.constant 1 : i32
    %310 = tpu.dynamic_rotate %309 by %c1_i32_113 dim 1 : vector<16x128xf32>, i32 -> vector<16x128xf32>
    %c60 = arith.constant 60 : index
    %c0_114 = arith.constant 0 : index
    %311 = vector.load %arg2[%c60, %c0_114] : memref<80x128xf32, #tpu.memory_space<vmem>>, vector<1x128xf32>
    %312 = vector.broadcast %311 : vector<1x128xf32> to vector<16x128xf32>
    %313 = arith.mulf %310, %312 : vector<16x128xf32>
    %314 = arith.addf %308, %313 : vector<16x128xf32>
    %c33_i32_115 = arith.constant 33 : i32
    %315 = tpu.dynamic_rotate %309 by %c33_i32_115 dim 1 : vector<16x128xf32>, i32 -> vector<16x128xf32>
    %c61 = arith.constant 61 : index
    %c0_116 = arith.constant 0 : index
    %316 = vector.load %arg2[%c61, %c0_116] : memref<80x128xf32, #tpu.memory_space<vmem>>, vector<1x128xf32>
    %317 = vector.broadcast %316 : vector<1x128xf32> to vector<16x128xf32>
    %318 = arith.mulf %315, %317 : vector<16x128xf32>
    %319 = arith.addf %314, %318 : vector<16x128xf32>
    %c65_i32_117 = arith.constant 65 : i32
    %320 = tpu.dynamic_rotate %309 by %c65_i32_117 dim 1 : vector<16x128xf32>, i32 -> vector<16x128xf32>
    %c62 = arith.constant 62 : index
    %c0_118 = arith.constant 0 : index
    %321 = vector.load %arg2[%c62, %c0_118] : memref<80x128xf32, #tpu.memory_space<vmem>>, vector<1x128xf32>
    %322 = vector.broadcast %321 : vector<1x128xf32> to vector<16x128xf32>
    %323 = arith.mulf %320, %322 : vector<16x128xf32>
    %324 = arith.addf %319, %323 : vector<16x128xf32>
    %c97_i32_119 = arith.constant 97 : i32
    %325 = tpu.dynamic_rotate %309 by %c97_i32_119 dim 1 : vector<16x128xf32>, i32 -> vector<16x128xf32>
    %c63 = arith.constant 63 : index
    %c0_120 = arith.constant 0 : index
    %326 = vector.load %arg2[%c63, %c0_120] : memref<80x128xf32, #tpu.memory_space<vmem>>, vector<1x128xf32>
    %327 = vector.broadcast %326 : vector<1x128xf32> to vector<16x128xf32>
    %328 = arith.mulf %325, %327 : vector<16x128xf32>
    %329 = arith.addf %324, %328 : vector<16x128xf32>
    %c64 = arith.constant 64 : index
    %c0_121 = arith.constant 0 : index
    %330 = vector.load %arg2[%c64, %c0_121] : memref<80x128xf32, #tpu.memory_space<vmem>>, vector<1x128xf32>
    %331 = vector.broadcast %330 : vector<1x128xf32> to vector<16x128xf32>
    %332 = arith.mulf %309, %331 : vector<16x128xf32>
    %333 = arith.addf %329, %332 : vector<16x128xf32>
    %c32_i32_122 = arith.constant 32 : i32
    %334 = tpu.dynamic_rotate %309 by %c32_i32_122 dim 1 : vector<16x128xf32>, i32 -> vector<16x128xf32>
    %c65 = arith.constant 65 : index
    %c0_123 = arith.constant 0 : index
    %335 = vector.load %arg2[%c65, %c0_123] : memref<80x128xf32, #tpu.memory_space<vmem>>, vector<1x128xf32>
    %336 = vector.broadcast %335 : vector<1x128xf32> to vector<16x128xf32>
    %337 = arith.mulf %334, %336 : vector<16x128xf32>
    %338 = arith.addf %333, %337 : vector<16x128xf32>
    %c64_i32_124 = arith.constant 64 : i32
    %339 = tpu.dynamic_rotate %309 by %c64_i32_124 dim 1 : vector<16x128xf32>, i32 -> vector<16x128xf32>
    %c66 = arith.constant 66 : index
    %c0_125 = arith.constant 0 : index
    %340 = vector.load %arg2[%c66, %c0_125] : memref<80x128xf32, #tpu.memory_space<vmem>>, vector<1x128xf32>
    %341 = vector.broadcast %340 : vector<1x128xf32> to vector<16x128xf32>
    %342 = arith.mulf %339, %341 : vector<16x128xf32>
    %343 = arith.addf %338, %342 : vector<16x128xf32>
    %c96_i32_126 = arith.constant 96 : i32
    %344 = tpu.dynamic_rotate %309 by %c96_i32_126 dim 1 : vector<16x128xf32>, i32 -> vector<16x128xf32>
    %c67 = arith.constant 67 : index
    %c0_127 = arith.constant 0 : index
    %345 = vector.load %arg2[%c67, %c0_127] : memref<80x128xf32, #tpu.memory_space<vmem>>, vector<1x128xf32>
    %346 = vector.broadcast %345 : vector<1x128xf32> to vector<16x128xf32>
    %347 = arith.mulf %344, %346 : vector<16x128xf32>
    %348 = arith.addf %343, %347 : vector<16x128xf32>
    %c127_i32_128 = arith.constant 127 : i32
    %349 = tpu.dynamic_rotate %309 by %c127_i32_128 dim 1 : vector<16x128xf32>, i32 -> vector<16x128xf32>
    %c68 = arith.constant 68 : index
    %c0_129 = arith.constant 0 : index
    %350 = vector.load %arg2[%c68, %c0_129] : memref<80x128xf32, #tpu.memory_space<vmem>>, vector<1x128xf32>
    %351 = vector.broadcast %350 : vector<1x128xf32> to vector<16x128xf32>
    %352 = arith.mulf %349, %351 : vector<16x128xf32>
    %353 = arith.addf %348, %352 : vector<16x128xf32>
    %c31_i32_130 = arith.constant 31 : i32
    %354 = tpu.dynamic_rotate %309 by %c31_i32_130 dim 1 : vector<16x128xf32>, i32 -> vector<16x128xf32>
    %c69 = arith.constant 69 : index
    %c0_131 = arith.constant 0 : index
    %355 = vector.load %arg2[%c69, %c0_131] : memref<80x128xf32, #tpu.memory_space<vmem>>, vector<1x128xf32>
    %356 = vector.broadcast %355 : vector<1x128xf32> to vector<16x128xf32>
    %357 = arith.mulf %354, %356 : vector<16x128xf32>
    %358 = arith.addf %353, %357 : vector<16x128xf32>
    %c63_i32_132 = arith.constant 63 : i32
    %359 = tpu.dynamic_rotate %309 by %c63_i32_132 dim 1 : vector<16x128xf32>, i32 -> vector<16x128xf32>
    %c70 = arith.constant 70 : index
    %c0_133 = arith.constant 0 : index
    %360 = vector.load %arg2[%c70, %c0_133] : memref<80x128xf32, #tpu.memory_space<vmem>>, vector<1x128xf32>
    %361 = vector.broadcast %360 : vector<1x128xf32> to vector<16x128xf32>
    %362 = arith.mulf %359, %361 : vector<16x128xf32>
    %363 = arith.addf %358, %362 : vector<16x128xf32>
    %c95_i32_134 = arith.constant 95 : i32
    %364 = tpu.dynamic_rotate %309 by %c95_i32_134 dim 1 : vector<16x128xf32>, i32 -> vector<16x128xf32>
    %c71 = arith.constant 71 : index
    %c0_135 = arith.constant 0 : index
    %365 = vector.load %arg2[%c71, %c0_135] : memref<80x128xf32, #tpu.memory_space<vmem>>, vector<1x128xf32>
    %366 = vector.broadcast %365 : vector<1x128xf32> to vector<16x128xf32>
    %367 = arith.mulf %364, %366 : vector<16x128xf32>
    %368 = arith.addf %363, %367 : vector<16x128xf32>
    %c74 = arith.constant 74 : index
    %c0_136 = arith.constant 0 : index
    %369 = vector.load %arg2[%c74, %c0_136] : memref<80x128xf32, #tpu.memory_space<vmem>>, vector<1x128xf32>
    %370 = vector.broadcast %369 : vector<1x128xf32> to vector<16x128xf32>
    %371 = arith.mulf %368, %370 : vector<16x128xf32>
    %c75 = arith.constant 75 : index
    %c0_137 = arith.constant 0 : index
    %372 = vector.load %arg2[%c75, %c0_137] : memref<80x128xf32, #tpu.memory_space<vmem>>, vector<1x128xf32>
    %373 = vector.broadcast %372 : vector<1x128xf32> to vector<16x128xf32>
    %374 = arith.addf %371, %373 : vector<16x128xf32>
    %375 = arith.addf %374, %0 : vector<16x128xf32>
    %cst_138 = arith.constant 0.000000e+00 : f32
    %376 = vector.broadcast %cst_138 : f32 to vector<16x128xf32>
    %377 = arith.maximumf %375, %376 : vector<16x128xf32>
    %c0_139 = arith.constant 0 : index
    %c0_140 = arith.constant 0 : index
    %378 = vector.load %arg3[%c0_139, %c0_140] : memref<16x128xf32, #tpu.memory_space<vmem>>, vector<16x128xf32>
    tpu.vector_store %arg3[%c0_139, %c0_140], %377 {strides = array<i32>} : memref<16x128xf32, #tpu.memory_space<vmem>>, vector<16x128xf32>,
    return
  }
  func.func @transform_0(%arg0: i32) -> (i32, i32) {
    %c0_i32 = arith.constant 0 : i32
    %c0_i32_0 = arith.constant 0 : i32
    %c0_i32_1 = arith.constant 0 : i32
    return %c0_i32, %c0_i32_0 : i32, i32
  }
  func.func @transform_1(%arg0: i32) -> (i32, i32) {
    %c0_i32 = arith.constant 0 : i32
    %c0_i32_0 = arith.constant 0 : i32
    %c0_i32_1 = arith.constant 0 : i32
    return %c0_i32, %c0_i32_0 : i32, i32
  }
  func.func @transform_2(%arg0: i32) -> (i32, i32) {
    %c0_i32 = arith.constant 0 : i32
    %c0_i32_0 = arith.constant 0 : i32
    %c0_i32_1 = arith.constant 0 : i32
    return %c0_i32, %c0_i32_0 : i32, i32
  }
}

</mosaic_0001>

<bundles_post_ra>
// kernel: tpu_custom_call.1
= control target key start
LH: loop header
LB: loop body
LE: loop exit
PB: predicated region body
PF: predicated region fallthrough
CT: control target
= control target key end

     0   :  { %7 = vsyncpa [#allocation3], 0  ;;  %s1646_s0 = inlined_call_operand.hbm [shape: f32[16,128], index: 0, kind: input, shape index: {}]   ;;  %s1647_s1 = inlined_call_operand.hbm [shape: f32[80,128], index: 1, kind: input, shape index: {}]   ;;  %s1648_s2 = inlined_call_operand.hbm [shape: f32[16,128], index: 2, kind: output, shape index: {}]  }
   0x1   :  { %8 = vsyncpa [#allocation6], 0 }
   0x2   :  { %9 = vsyncpa [#allocation4], 0  ;;  %s1194_s9 = smov [#allocation2]   ;;  %s1122_s13 = scalar_lea.hbm %s1646_s0, 256 }
   0x3   :  { %s15_s10 = sshll.u32 %s1194_s9, 4  ;;  %p1123_p0 = scmp.ne.s32.totalorder %s1646_s0, %s1122_s13  ;;  %s16_s10 = int_to_ptr.vmem [resolvable:$true] %s15_s10 }
   0x4   :  { %p1126_p1 = scmp.lt.u32.totalorder %s1122_s13, %s1646_s0 }
   0x6   :  { %p1128_p2 = pnand %p1126_p1, %p1123_p0 }
   0x8   :  { %1131 = shalt.err (!%p1128_p2)
}
   0x9   :  { %s1132_s18 = scalar_lea.vmem %s16_s10, 256  ;;  %p1137_p4 = scmp.lt.s32.totalorder %s16_s10, %s16_s10 }
   0xa   :  { %p1133_p3 = scmp.ne.s32.totalorder %s16_s10, %s1132_s18  ;;  %p1138_p5 = scmp.lt.s32.totalorder %s1132_s18, %s1132_s18 }
   0xc   :  { %p1139_p6 = por %p1138_p5, %p1137_p4 }
   0xe   :  { %p1140_p7 = pnand %p1139_p6, %p1133_p3 }
  0x10   :  { %1143 = shalt.err (!%p1140_p7)
}
  0x11   :  { %s1195_s19 = smov 128   ;;  %s1196_s20 = smov 8  }
  0x12   :  { %21 = dma.hbm_to_vmem [thread:$0]  %s1646_s0, 256, %s16_s10, [#allocation3], %s1195_s19, %s1195_s19, %s1196_s20  }
  0x13   :  { %s1197_s23 = smov [#allocation5]   ;;  %s1144_s27 = scalar_lea.hbm %s1647_s1, 1280 }
  0x14   :  { %s27_s24 = sshll.u32 %s1197_s23, 4  ;;  %p1145_p8 = scmp.ne.s32.totalorder %s1647_s1, %s1144_s27  ;;  %s28_s24 = int_to_ptr.vmem [resolvable:$true] %s27_s24 }
  0x15   :  { %p1148_p9 = scmp.lt.u32.totalorder %s1144_s27, %s1647_s1 }
  0x17   :  { %p1150_p10 = pnand %p1148_p9, %p1145_p8 }
  0x19   :  { %1153 = shalt.err (!%p1150_p10)
}
  0x1a   :  { %s1154_s4 = scalar_lea.vmem %s28_s24, 1280  ;;  %p1159_p12 = scmp.lt.s32.totalorder %s28_s24, %s28_s24 }
  0x1b   :  { %p1155_p11 = scmp.ne.s32.totalorder %s28_s24, %s1154_s4  ;;  %p1160_p13 = scmp.lt.s32.totalorder %s1154_s4, %s1154_s4 }
  0x1d   :  { %p1161_p0 = por %p1160_p13, %p1159_p12 }
  0x1f   :  { %p1162_p1 = pnand %p1161_p0, %p1155_p11 }
  0x21   :  { %1165 = shalt.err (!%p1162_p1)
}
  0x22   :  { %33 = dma.hbm_to_vmem [thread:$0]  %s1647_s1, 1280, %s28_s24, [#allocation6], %s1195_s19, %s1195_s19, %s1196_s20  }
  0x23   :  { %1188 = dma.done.wait [#allocation3], 256  }
  0x24   :  { %1189 = vsyncadd [#allocation3], 4294967040 }
  0x25   :  { %1190 = dma.done.wait [#allocation6], 1280  }
  0x26   :  { %1191 = vsyncadd [#allocation6], 4294966016  ;;  %v44_v0 = vlaneseq  ;;  %v1257_v2 = vld [vmem:[#allocation2] sm:$0xff]  ;;  %v1259_v3 = vld [vmem:[#allocation2 + $0x8] sm:$0xff]  ;;  %s1198_s1 = smov 33   ;;  %s1199_s6 = smov 1  }
  0x27   :  { %v42_v4 = vrot.slane %v1257_v2, 7  ;;  %v43_v5 = vrot.slane %v1259_v3, 7  ;;  %s1200_s7 = smov 65   ;;  %s1201_s8 = smov 97   ;;  %v353_v8 = vrot.slane %v1257_v2, 1  ;;  %v354_v9 = vrot.slane %v1259_v3, 1 }
  0x28   :  { %v1255_v1 = vshrl.u32 %v44_v0, 7  ;;  %s1202_s9 = smov 32   ;;  %s1203_s10 = smov 64   ;;  %v1029_v30 = vld [vmem:[#allocation5 + $0x1] ss:$0 sm:$0xff] }
  0x29   :  { %s1204_s11 = smov 96   ;;  %s1205_s12 = smov 127   ;;  %v1028_v31 = vld [vmem:[#allocation5] ss:$0 sm:$0xff]  ;;  %v1030_v34 = vld [vmem:[#allocation5 + $0x2] ss:$0 sm:$0xff] }
  0x2a   :  { %vm46_vm0 = vcmp.lt.s32.totalorder %v1255_v1, 1  ;;  %s1206_s13 = smov 31   ;;  %s1207_s14 = smov 63   ;;  %vm355_vm1 = vcmp.lt.s32.totalorder %v1255_v1, 7  ;;  %v1031_v39 = vld [vmem:[#allocation5 + $0x3] ss:$0 sm:$0xff] }
  0x2b   :  { %v1266_v6 = vsel %vm46_vm0, %v43_v5, %v42_v4  ;;  %v1274_v7 = vsel %vm46_vm0, %v42_v4, %v43_v5  ;;  %s1208_s15 = smov 95   ;;  %v1365_v10 = vsel %vm355_vm1, %v354_v9, %v353_v8  ;;  %v1369_v11 = vsel %vm355_vm1, %v353_v8, %v354_v9  ;;  %v1032_v48 = vld [vmem:[#allocation5 + $0x4] ss:$0 sm:$0xff]  ;;  %v1033_v57 = vld [vmem:[#allocation5 + $0x5] ss:$0 sm:$0xff]  ;;  %s1209_s16 = smov [#allocation7]  }
  0x2c   :  { %62 = vrot.lane.b32.xlu1 %v1266_v6, %s1198_s1  ;;  %49 = vrot.lane.b32.xlu0 %v1266_v6, %s1199_s6  ;;  %v107_v55 = vmul.f32 %v1032_v48, %v1274_v7  ;;  %v106_v56 = vmul.f32 %v1032_v48, %v1266_v6  ;;  %v1034_v60 = vld [vmem:[#allocation5 + $0x6] ss:$0 sm:$0xff]  ;;  %v1035_v4 = vld [vmem:[#allocation5 + $0x7] ss:$0 sm:$0xff]  ;;  %v1041_v48 = vld [vmem:[#allocation5 + $0xd] ss:$0 sm:$0xff] }
  0x2d   :  { %s1015_s17 = sshll.u32 %s1209_s16, 4  ;;  %s1016_s17 = int_to_ptr.vmem [resolvable:$true] %s1015_s17 }
  0x2e   :  { %s1166_s18 = scalar_lea.vmem %s1016_s17, 256  ;;  %p1171_p3 = scmp.lt.s32.totalorder %s1016_s17, %s1016_s17 }
  0x2f   :  { %p1167_p2 = scmp.ne.s32.totalorder %s1016_s17, %s1166_s18  ;;  %p1172_p4 = scmp.lt.s32.totalorder %s1166_s18, %s1166_s18 }
  0x30   :  { %64 = vrot.lane.b32.xlu1 %v1274_v7, %s1198_s1  ;;  %51 = vrot.lane.b32.xlu0 %v1274_v7, %s1199_s6 }
  0x31   :  { %p1173_p5 = por %p1172_p4, %p1171_p3 }
  0x33   :  { %p1174_p6 = pnand %p1173_p5, %p1167_p2 }
  0x34   :  { %77 = vrot.lane.b32.xlu1 %v1274_v7, %s1200_s7  ;;  %75 = vrot.lane.b32.xlu0 %v1266_v6, %s1200_s7 }
  0x38   :  { %90 = vrot.lane.b32.xlu1 %v1274_v7, %s1201_s8  ;;  %88 = vrot.lane.b32.xlu0 %v1266_v6, %s1201_s8 }
  0x3c   :  { %112 = vrot.lane.b32.xlu1 %v1274_v7, %s1202_s9  ;;  %110 = vrot.lane.b32.xlu0 %v1266_v6, %s1202_s9 }
  0x40   :  { %125 = vrot.lane.b32.xlu1 %v1274_v7, %s1203_s10  ;;  %123 = vrot.lane.b32.xlu0 %v1266_v6, %s1203_s10 }
  0x44   :  { %138 = vrot.lane.b32.xlu1 %v1274_v7, %s1204_s11  ;;  %136 = vrot.lane.b32.xlu0 %v1266_v6, %s1204_s11 }
  0x48   :  { %151 = vrot.lane.b32.xlu1 %v1274_v7, %s1205_s12  ;;  %149 = vrot.lane.b32.xlu0 %v1266_v6, %s1205_s12 }
  0x4c   :  { %164 = vrot.lane.b32.xlu1 %v1274_v7, %s1206_s13  ;;  %162 = vrot.lane.b32.xlu0 %v1266_v6, %s1206_s13 }
  0x50   :  { %177 = vrot.lane.b32.xlu1 %v1274_v7, %s1207_s14  ;;  %175 = vrot.lane.b32.xlu0 %v1266_v6, %s1207_s14 }
  0x54   :  { %190 = vrot.lane.b32.xlu1 %v1274_v7, %s1208_s15  ;;  %188 = vrot.lane.b32.xlu0 %v1266_v6, %s1208_s15 }
  0x58   :  { %203 = vrot.lane.b32.xlu1 %v1259_v3, %s1199_s6  ;;  %201 = vrot.lane.b32.xlu0 %v1257_v2, %s1199_s6 }
  0x5c   :  { %216 = vrot.lane.b32.xlu1 %v1259_v3, %s1198_s1  ;;  %214 = vrot.lane.b32.xlu0 %v1257_v2, %s1198_s1 }
  0x60   :  { %229 = vrot.lane.b32.xlu1 %v1259_v3, %s1200_s7  ;;  %227 = vrot.lane.b32.xlu0 %v1257_v2, %s1200_s7 }
  0x64   :  { %242 = vrot.lane.b32.xlu1 %v1259_v3, %s1201_s8  ;;  %240 = vrot.lane.b32.xlu0 %v1257_v2, %s1201_s8 }
  0x68   :  { %264 = vrot.lane.b32.xlu1 %v1259_v3, %s1202_s9  ;;  %262 = vrot.lane.b32.xlu0 %v1257_v2, %s1202_s9 }
  0x6c   :  { %277 = vrot.lane.b32.xlu1 %v1259_v3, %s1203_s10  ;;  %275 = vrot.lane.b32.xlu0 %v1257_v2, %s1203_s10 }
  0x70   :  { %290 = vrot.lane.b32.xlu1 %v1259_v3, %s1204_s11  ;;  %288 = vrot.lane.b32.xlu0 %v1257_v2, %s1204_s11 }
  0x74   :  { %303 = vrot.lane.b32.xlu1 %v1259_v3, %s1205_s12  ;;  %301 = vrot.lane.b32.xlu0 %v1257_v2, %s1205_s12 }
  0x78   :  { %316 = vrot.lane.b32.xlu1 %v1259_v3, %s1206_s13  ;;  %314 = vrot.lane.b32.xlu0 %v1257_v2, %s1206_s13 }
  0x7c   :  { %329 = vrot.lane.b32.xlu1 %v1259_v3, %s1207_s14  ;;  %327 = vrot.lane.b32.xlu0 %v1257_v2, %s1207_s14 }
  0x80   :  { %342 = vrot.lane.b32.xlu1 %v1259_v3, %s1208_s15  ;;  %340 = vrot.lane.b32.xlu0 %v1257_v2, %s1208_s15 }
  0x84   :  { %360 = vrot.lane.b32.xlu1 %v1365_v10, %s1199_s6  ;;  %358 = vrot.lane.b32.xlu0 %v1369_v11, %s1199_s6 }
  0x88   :  { %373 = vrot.lane.b32.xlu1 %v1365_v10, %s1198_s1  ;;  %371 = vrot.lane.b32.xlu0 %v1369_v11, %s1198_s1 }
  0x8c   :  { %386 = vrot.lane.b32.xlu1 %v1365_v10, %s1200_s7  ;;  %384 = vrot.lane.b32.xlu0 %v1369_v11, %s1200_s7 }
  0x90   :  { %399 = vrot.lane.b32.xlu1 %v1365_v10, %s1201_s8  ;;  %397 = vrot.lane.b32.xlu0 %v1369_v11, %s1201_s8 }
  0x94   :  { %421 = vrot.lane.b32.xlu1 %v1365_v10, %s1202_s9  ;;  %419 = vrot.lane.b32.xlu0 %v1369_v11, %s1202_s9 }
  0x98   :  { %434 = vrot.lane.b32.xlu1 %v1365_v10, %s1203_s10  ;;  %432 = vrot.lane.b32.xlu0 %v1369_v11, %s1203_s10 }
  0x9c   :  { %447 = vrot.lane.b32.xlu1 %v1365_v10, %s1204_s11  ;;  %445 = vrot.lane.b32.xlu0 %v1369_v11, %s1204_s11 }
  0x9e   :  { %v63_v12 = vpop.permute.xlu1 %62  ;;  %v50_v13 = vpop.permute.xlu0 %49 }
  0x9f   :  { %v71_v35 = vmul.f32 %v1029_v30, %v63_v12  ;;  %v58_v36 = vmul.f32 %v1028_v31, %v50_v13  ;;  %v1036_v13 = vld [vmem:[#allocation5 + $0x8] ss:$0 sm:$0xff] }
  0xa0   :  { %460 = vrot.lane.b32.xlu1 %v1365_v10, %s1205_s12  ;;  %458 = vrot.lane.b32.xlu0 %v1369_v11, %s1205_s12 }
  0xa1   :  { %v73_v44 = vadd.f32 %v71_v35, %v58_v36 }
  0xa2   :  { %v65_v14 = vpop.permute.xlu1 %64  ;;  %v52_v15 = vpop.permute.xlu0 %51 }
  0xa3   :  { %v72_v37 = vmul.f32 %v1029_v30, %v65_v14  ;;  %v59_v38 = vmul.f32 %v1028_v31, %v52_v15 }
  0xa4   :  { %473 = vrot.lane.b32.xlu1 %v1365_v10, %s1206_s13  ;;  %471 = vrot.lane.b32.xlu0 %v1369_v11, %s1206_s13 }
  0xa5   :  { %v74_v45 = vadd.f32 %v72_v37, %v59_v38  ;;  %v1039_v38 = vld [vmem:[#allocation5 + $0xb] ss:$0 sm:$0xff] }
  0xa6   :  { %v78_v16 = vpop.permute.xlu1 %77  ;;  %v76_v17 = vpop.permute.xlu0 %75 }
  0xa7   :  { %v85_v42 = vmul.f32 %v1030_v34, %v78_v16  ;;  %v84_v43 = vmul.f32 %v1030_v34, %v76_v17  ;;  %v1037_v17 = vld [vmem:[#allocation5 + $0x9] ss:$0 sm:$0xff] }
  0xa8   :  { %486 = vrot.lane.b32.xlu1 %v1365_v10, %s1207_s14  ;;  %484 = vrot.lane.b32.xlu0 %v1369_v11, %s1207_s14 }
  0xa9   :  { %v87_v51 = vadd.f32 %v85_v42, %v74_v45  ;;  %v86_v52 = vadd.f32 %v84_v43, %v73_v44 }
  0xaa   :  { %v91_v18 = vpop.permute.xlu1 %90  ;;  %v89_v19 = vpop.permute.xlu0 %88 }
  0xab   :  { %v98_v46 = vmul.f32 %v1031_v39, %v91_v18  ;;  %v97_v47 = vmul.f32 %v1031_v39, %v89_v19 }
  0xac   :  { %499 = vrot.lane.b32.xlu1 %v1365_v10, %s1208_s15  ;;  %497 = vrot.lane.b32.xlu0 %v1369_v11, %s1208_s15 }
  0xad   :  { %v100_v53 = vadd.f32 %v98_v46, %v87_v51  ;;  %v99_v54 = vadd.f32 %v97_v47, %v86_v52 }
  0xae   :  { %v113_v20 = vpop.permute.xlu1 %112  ;;  %v111_v21 = vpop.permute.xlu0 %110 }
  0xaf   :  { %v109_v61 = vadd.f32 %v107_v55, %v100_v53  ;;  %v120_v62 = vmul.f32 %v1033_v57, %v113_v20  ;;  %v108_v63 = vadd.f32 %v106_v56, %v99_v54  ;;  %v119_v0 = vmul.f32 %v1033_v57, %v111_v21  ;;  %v1038_v20 = vld [vmem:[#allocation5 + $0xa] ss:$0 sm:$0xff] }
  0xb1   :  { %v122_v14 = vadd.f32 %v120_v62, %v109_v61  ;;  %v121_v15 = vadd.f32 %v119_v0, %v108_v63 }
  0xb2   :  { %v126_v22 = vpop.permute.xlu1 %125  ;;  %v124_v23 = vpop.permute.xlu0 %123 }
  0xb3   :  { %v133_v9 = vmul.f32 %v1034_v60, %v126_v22  ;;  %v132_v12 = vmul.f32 %v1034_v60, %v124_v23  ;;  %v1043_v60 = vld [vmem:[#allocation5 + $0xf] ss:$0 sm:$0xff] }
  0xb5   :  { %v135_v19 = vadd.f32 %v133_v9, %v122_v14  ;;  %v134_v30 = vadd.f32 %v132_v12, %v121_v15  ;;  %v1044_v12 = vld [vmem:[#allocation5 + $0x10] ss:$0 sm:$0xff] }
  0xb6   :  { %v139_v24 = vpop.permute.xlu1 %138  ;;  %v137_v25 = vpop.permute.xlu0 %136 }
  0xb7   :  { %v146_v16 = vmul.f32 %v1035_v4, %v139_v24  ;;  %v145_v7 = vmul.f32 %v1035_v4, %v137_v25  ;;  %v1040_v25 = vld [vmem:[#allocation5 + $0xc] ss:$0 sm:$0xff] }
  0xb9   :  { %v148_v35 = vadd.f32 %v146_v16, %v135_v19  ;;  %v147_v21 = vadd.f32 %v145_v7, %v134_v30  ;;  %v1045_v7 = vld [vmem:[#allocation5 + $0x11] ss:$0 sm:$0xff] }
  0xba   :  { %v152_v26 = vpop.permute.xlu1 %151  ;;  %v150_v27 = vpop.permute.xlu0 %149 }
  0xbb   :  { %v159_v31 = vmul.f32 %v1036_v13, %v152_v26  ;;  %v158_v34 = vmul.f32 %v1036_v13, %v150_v27 }
  0xbd   :  { %v161_v39 = vadd.f32 %v159_v31, %v148_v35  ;;  %v160_v42 = vadd.f32 %v158_v34, %v147_v21 }
  0xbe   :  { %v165_v28 = vpop.permute.xlu1 %164  ;;  %v163_v29 = vpop.permute.xlu0 %162 }
  0xbf   :  { %v172_v36 = vmul.f32 %v1037_v17, %v165_v28  ;;  %v171_v37 = vmul.f32 %v1037_v17, %v163_v29  ;;  %v1042_v29 = vld [vmem:[#allocation5 + $0xe] ss:$0 sm:$0xff] }
  0xc1   :  { %v174_v44 = vadd.f32 %v172_v36, %v161_v39  ;;  %v173_v45 = vadd.f32 %v171_v37, %v160_v42  ;;  %v1048_v36 = vld [vmem:[#allocation5 + $0x14] ss:$0 sm:$0xff]  ;;  %v1049_v42 = vld [vmem:[#allocation5 + $0x15] ss:$0 sm:$0xff] }
  0xc2   :  { %v178_v32 = vpop.permute.xlu1 %177  ;;  %v176_v33 = vpop.permute.xlu0 %175 }
  0xc3   :  { %v185_v43 = vmul.f32 %v1038_v20, %v178_v32  ;;  %v184_v24 = vmul.f32 %v1038_v20, %v176_v33 }
  0xc5   :  { %v187_v51 = vadd.f32 %v185_v43, %v174_v44  ;;  %v186_v52 = vadd.f32 %v184_v24, %v173_v45 }
  0xc6   :  { %v191_v40 = vpop.permute.xlu1 %190  ;;  %v189_v41 = vpop.permute.xlu0 %188 }
  0xc7   :  { %v198_v46 = vmul.f32 %v1039_v38, %v191_v40  ;;  %v197_v47 = vmul.f32 %v1039_v38, %v189_v41 }
  0xc9   :  { %v200_v54 = vadd.f32 %v198_v46, %v187_v51  ;;  %v199_v55 = vadd.f32 %v197_v47, %v186_v52  ;;  %v1051_v51 = vld [vmem:[#allocation5 + $0x17] ss:$0 sm:$0xff] }
  0xca   :  { %v204_v49 = vpop.permute.xlu1 %203  ;;  %v202_v50 = vpop.permute.xlu0 %201 }
  0xcb   :  { %v211_v53 = vmul.f32 %v1040_v25, %v204_v49  ;;  %v210_v28 = vmul.f32 %v1040_v25, %v202_v50 }
  0xcd   :  { %v213_v61 = vadd.f32 %v211_v53, %v200_v54  ;;  %v212_v62 = vadd.f32 %v210_v28, %v199_v55  ;;  %v1052_v54 = vld [vmem:[#allocation5 + $0x18] ss:$0 sm:$0xff] }
  0xce   :  { %v217_v58 = vpop.permute.xlu1 %216  ;;  %v215_v59 = vpop.permute.xlu0 %214 }
  0xcf   :  { %v224_v56 = vmul.f32 %v1041_v48, %v217_v58  ;;  %v223_v57 = vmul.f32 %v1041_v48, %v215_v59  ;;  %v259_v58 = vmul.f32 %v1044_v12, %v1259_v3  ;;  %v258_v59 = vmul.f32 %v1044_v12, %v1257_v2 }
  0xd1   :  { %v226_v41 = vadd.f32 %v224_v56, %v213_v61  ;;  %v225_v0 = vadd.f32 %v223_v57, %v212_v62 }
  0xd2   :  { %v230_v5 = vpop.permute.xlu1 %229  ;;  %v228_v8 = vpop.permute.xlu0 %227 }
  0xd3   :  { %v237_v63 = vmul.f32 %v1042_v29, %v230_v5  ;;  %v236_v40 = vmul.f32 %v1042_v29, %v228_v8  ;;  %v1046_v5 = vld [vmem:[#allocation5 + $0x12] ss:$0 sm:$0xff] }
  0xd5   :  { %v239_v50 = vadd.f32 %v237_v63, %v226_v41  ;;  %v238_v14 = vadd.f32 %v236_v40, %v225_v0  ;;  %v1054_v0 = vld [vmem:[#allocation5 + $0x1a] ss:$0 sm:$0xff] }
  0xd6   :  { %v243_v6 = vpop.permute.xlu1 %242  ;;  %v241_v18 = vpop.permute.xlu0 %240 }
  0xd7   :  { %v250_v4 = vmul.f32 %v1043_v60, %v243_v6  ;;  %v249_v9 = vmul.f32 %v1043_v60, %v241_v18  ;;  %v1047_v18 = vld [vmem:[#allocation5 + $0x13] ss:$0 sm:$0xff] }
  0xd9   :  { %v252_v15 = vadd.f32 %v250_v4, %v239_v50  ;;  %v251_v16 = vadd.f32 %v249_v9, %v238_v14 }
  0xda   :  { %v265_v22 = vpop.permute.xlu1 %264  ;;  %v263_v23 = vpop.permute.xlu0 %262 }
  0xdb   :  { %v261_v8 = vadd.f32 %v259_v58, %v252_v15  ;;  %v272_v30 = vmul.f32 %v1045_v7, %v265_v22  ;;  %v260_v31 = vadd.f32 %v258_v59, %v251_v16  ;;  %v271_v6 = vmul.f32 %v1045_v7, %v263_v23  ;;  %v1050_v22 = vld [vmem:[#allocation5 + $0x16] ss:$0 sm:$0xff]  ;;  %v1056_v59 = vld [vmem:[#allocation5 + $0x1c] ss:$0 sm:$0xff]  ;;  %v1055_v7 = vld [vmem:[#allocation5 + $0x1b] ss:$0 sm:$0xff] }
  0xdd   :  { %v274_v37 = vadd.f32 %v272_v30, %v261_v8  ;;  %v273_v38 = vadd.f32 %v271_v6, %v260_v31  ;;  %v416_v30 = vmul.f32 %v1056_v59, %v1365_v10  ;;  %v415_v31 = vmul.f32 %v1056_v59, %v1369_v11  ;;  %v1064_v59 = vld [vmem:[#allocation5 + $0x48] ss:$0 sm:$0xff] }
  0xde   :  { %v278_v26 = vpop.permute.xlu1 %277  ;;  %v276_v27 = vpop.permute.xlu0 %275 }
  0xdf   :  { %v285_v35 = vmul.f32 %v1046_v5, %v278_v26  ;;  %v284_v21 = vmul.f32 %v1046_v5, %v276_v27 }
  0xe1   :  { %v287_v24 = vadd.f32 %v285_v35, %v274_v37  ;;  %v286_v25 = vadd.f32 %v284_v21, %v273_v38 }
  0xe2   :  { %v291_v32 = vpop.permute.xlu1 %290  ;;  %v289_v33 = vpop.permute.xlu0 %288 }
  0xe3   :  { %v298_v39 = vmul.f32 %v1047_v18, %v291_v32  ;;  %v297_v3 = vmul.f32 %v1047_v18, %v289_v33  ;;  %v1053_v32 = vld [vmem:[#allocation5 + $0x19] ss:$0 sm:$0xff] }
  0xe5   :  { %v300_v46 = vadd.f32 %v298_v39, %v287_v24  ;;  %v299_v23 = vadd.f32 %v297_v3, %v286_v25  ;;  %v1058_v25 = vld [vmem:[#allocation5 + $0x1e] ss:$0 sm:$0xff] }
  0xe6   :  { %v304_v13 = vpop.permute.xlu1 %303  ;;  %v302_v49 = vpop.permute.xlu0 %301 }
  0xe7   :  { %v311_v44 = vmul.f32 %v1048_v36, %v304_v13  ;;  %v310_v45 = vmul.f32 %v1048_v36, %v302_v49 }
  0xe9   :  { %v313_v52 = vadd.f32 %v311_v44, %v300_v46  ;;  %v312_v53 = vadd.f32 %v310_v45, %v299_v23  ;;  %v1059_v45 = vld [vmem:[#allocation5 + $0x1f] ss:$0 sm:$0xff] }
  0xea   :  { %v317_v17 = vpop.permute.xlu1 %316  ;;  %v315_v19 = vpop.permute.xlu0 %314 }
  0xeb   :  { %v324_v47 = vmul.f32 %v1049_v42, %v317_v17  ;;  %v323_v48 = vmul.f32 %v1049_v42, %v315_v19 }
  0xed   :  { %v326_v55 = vadd.f32 %v324_v47, %v313_v52  ;;  %v325_v56 = vadd.f32 %v323_v48, %v312_v53  ;;  %v1060_v47 = vld [vmem:[#allocation5 + $0x20] ss:$0 sm:$0xff]  ;;  %v1061_v52 = vld [vmem:[#allocation5 + $0x21] ss:$0 sm:$0xff] }
  0xee   :  { %v330_v34 = vpop.permute.xlu1 %329  ;;  %v328_v20 = vpop.permute.xlu0 %327 }
  0xef   :  { %v337_v28 = vmul.f32 %v1050_v22, %v330_v34  ;;  %v336_v29 = vmul.f32 %v1050_v22, %v328_v20 }
  0xf1   :  { %v339_v62 = vadd.f32 %v337_v28, %v326_v55  ;;  %v338_v63 = vadd.f32 %v336_v29, %v325_v56 }
  0xf2   :  { %v343_v2 = vpop.permute.xlu1 %342  ;;  %v341_v43 = vpop.permute.xlu0 %340 }
  0xf3   :  { %v350_v57 = vmul.f32 %v1051_v51, %v343_v2  ;;  %v349_v60 = vmul.f32 %v1051_v51, %v341_v43  ;;  %v1057_v2 = vld [vmem:[#allocation5 + $0x1d] ss:$0 sm:$0xff] }
  0xf5   :  { %v352_v4 = vadd.f32 %v350_v57, %v339_v62  ;;  %v351_v9 = vadd.f32 %v349_v60, %v338_v63  ;;  %v1062_v57 = vld [vmem:[#allocation5 + $0x22] ss:$0 sm:$0xff] }
  0xf6   :  { %v361_v26 = vpop.permute.xlu1 %360  ;;  %v359_v27 = vpop.permute.xlu0 %358 }
  0xf7   :  { %v368_v40 = vmul.f32 %v1052_v54, %v361_v26  ;;  %v367_v41 = vmul.f32 %v1052_v54, %v359_v27 }
  0xf9   :  { %v370_v14 = vadd.f32 %v368_v40, %v352_v4  ;;  %v369_v15 = vadd.f32 %v367_v41, %v351_v9  ;;  %v1063_v9 = vld [vmem:[#allocation5 + $0x23] ss:$0 sm:$0xff] }
  0xfa   :  { %v374_v33 = vpop.permute.xlu1 %373  ;;  %v372_v61 = vpop.permute.xlu0 %371 }
  0xfb   :  { %v381_v12 = vmul.f32 %v1053_v32, %v374_v33  ;;  %v380_v13 = vmul.f32 %v1053_v32, %v372_v61 }
  0xfd   :  { %v383_v17 = vadd.f32 %v381_v12, %v370_v14  ;;  %v382_v19 = vadd.f32 %v380_v13, %v369_v15 }
  0xfe   :  { %v387_v49 = vpop.permute.xlu1 %386  ;;  %v385_v50 = vpop.permute.xlu0 %384 }
  0xff   :  { %v394_v16 = vmul.f32 %v1054_v0, %v387_v49  ;;  %v393_v58 = vmul.f32 %v1054_v0, %v385_v50 }
 0x101   :  { %v396_v6 = vadd.f32 %v394_v16, %v383_v17  ;;  %v395_v18 = vadd.f32 %v393_v58, %v382_v19  ;;  %v1065_v19 = vld [vmem:[#allocation5 + $0x49] ss:$0 sm:$0xff] }
 0x102   :  { %v400_v5 = vpop.permute.xlu1 %399  ;;  %v398_v8 = vpop.permute.xlu0 %397 }
 0x103   :  { %v407_v34 = vmul.f32 %v1055_v7, %v400_v5  ;;  %v406_v20 = vmul.f32 %v1055_v7, %v398_v8 }
 0x105   :  { %v409_v35 = vadd.f32 %v407_v34, %v396_v6  ;;  %v408_v21 = vadd.f32 %v406_v20, %v395_v18 }
 0x106   :  { %v422_v36 = vpop.permute.xlu1 %421  ;;  %v420_v37 = vpop.permute.xlu0 %419 }
 0x107   :  { %v418_v38 = vadd.f32 %v416_v30, %v409_v35  ;;  %v417_v39 = vadd.f32 %v415_v31, %v408_v21  ;;  %v429_v44 = vmul.f32 %v1057_v2, %v422_v36  ;;  %v428_v10 = vmul.f32 %v1057_v2, %v420_v37 }
 0x109   :  { %v431_v48 = vadd.f32 %v429_v44, %v418_v38  ;;  %v430_v51 = vadd.f32 %v428_v10, %v417_v39 }
 0x10a   :  { %v435_v3 = vpop.permute.xlu1 %434  ;;  %v433_v42 = vpop.permute.xlu0 %432 }
 0x10b   :  { %v442_v46 = vmul.f32 %v1058_v25, %v435_v3  ;;  %v441_v23 = vmul.f32 %v1058_v25, %v433_v42 }
 0x10d   :  { %v444_v29 = vadd.f32 %v442_v46, %v431_v48  ;;  %v443_v54 = vadd.f32 %v441_v23, %v430_v51 }
 0x10e   :  { %v448_v43 = vpop.permute.xlu1 %447  ;;  %v446_v24 = vpop.permute.xlu0 %445 }
 0x10f   :  { %v455_v26 = vmul.f32 %v1059_v45, %v448_v43  ;;  %v454_v27 = vmul.f32 %v1059_v45, %v446_v24 }
 0x111   :  { %v457_v60 = vadd.f32 %v455_v26, %v444_v29  ;;  %v456_v32 = vadd.f32 %v454_v27, %v443_v54  ;;  %v1067_v29 = vld [vmem:[#allocation5 + $0x25] ss:$0 sm:$0xff] }
 0x112   :  { %v461_v11 = vpop.permute.xlu1 %460  ;;  %v459_v22 = vpop.permute.xlu0 %458 }
 0x113   :  { %v468_v55 = vmul.f32 %v1060_v47, %v461_v11  ;;  %v467_v56 = vmul.f32 %v1060_v47, %v459_v22 }
 0x115   :  { %v470_v40 = vadd.f32 %v468_v55, %v457_v60  ;;  %v469_v41 = vadd.f32 %v467_v56, %v456_v32  ;;  %v1066_v56 = vld [vmem:[#allocation5 + $0x24] ss:$0 sm:$0xff] }
 0x116   :  { %v474_v53 = vpop.permute.xlu1 %473  ;;  %v472_v28 = vpop.permute.xlu0 %471 }
 0x117   :  { %v481_v33 = vmul.f32 %v1061_v52, %v474_v53  ;;  %v480_v61 = vmul.f32 %v1061_v52, %v472_v28 }
 0x119   :  { %v483_v12 = vadd.f32 %v481_v33, %v470_v40  ;;  %v482_v13 = vadd.f32 %v480_v61, %v469_v41  ;;  %v1069_v33 = vld [vmem:[#allocation5 + $0x27] ss:$0 sm:$0xff] }
 0x11a   :  { %v487_v62 = vpop.permute.xlu1 %486  ;;  %v485_v63 = vpop.permute.xlu0 %484 }
 0x11b   :  { %v494_v0 = vmul.f32 %v1062_v57, %v487_v62  ;;  %v493_v4 = vmul.f32 %v1062_v57, %v485_v63  ;;  %v1068_v57 = vld [vmem:[#allocation5 + $0x26] ss:$0 sm:$0xff] }
 0x11d   :  { %v496_v14 = vadd.f32 %v494_v0, %v483_v12  ;;  %v495_v15 = vadd.f32 %v493_v4, %v482_v13 }
 0x11e   :  { %v500_v49 = vpop.permute.xlu1 %499  ;;  %v498_v50 = vpop.permute.xlu0 %497 }
 0x11f   :  { %v507_v16 = vmul.f32 %v1063_v9, %v500_v49  ;;  %v506_v58 = vmul.f32 %v1063_v9, %v498_v50 }
 0x121   :  { %v509_v7 = vadd.f32 %v507_v16, %v496_v14  ;;  %v508_v17 = vadd.f32 %v506_v58, %v495_v15  ;;  %v1070_v16 = vld [vmem:[#allocation5 + $0x28] ss:$0 sm:$0xff] }
 0x123   :  { %v516_v5 = vmul.f32 %v1064_v59, %v509_v7  ;;  %v515_v8 = vmul.f32 %v1064_v59, %v508_v17  ;;  %v1071_v7 = vld [vmem:[#allocation5 + $0x29] ss:$0 sm:$0xff] }
 0x125   :  { %v523_v30 = vadd.f32 %v1065_v19, %v516_v5  ;;  %v522_v31 = vadd.f32 %v1065_v19, %v515_v8 }
 0x127   :  { %v1421_v6 = vmax.f32 %v523_v30, 0.0  ;;  %v1423_v18 = vmax.f32 %v522_v31, 0.0  ;;  %v1072_v30 = vld [vmem:[#allocation5 + $0x2a] ss:$0 sm:$0xff] }
 0x129   :  { %682 = vrot.lane.b32.xlu0 %v1423_v18, %s1199_s6  ;;  %684 = vrot.lane.b32.xlu1 %v1421_v6, %s1199_s6  ;;  %v526_v34 = vrot.slane %v1423_v18, 7  ;;  %v527_v20 = vrot.slane %v1421_v6, 7  ;;  %v834_v36 = vrot.slane %v1423_v18, 1  ;;  %v835_v37 = vrot.slane %v1421_v6, 1 }
 0x12b   :  { %v1461_v35 = vsel %vm46_vm0, %v527_v20, %v526_v34  ;;  %v1465_v21 = vsel %vm46_vm0, %v526_v34, %v527_v20  ;;  %v1527_v38 = vsel %vm355_vm1, %v834_v36, %v835_v37  ;;  %v1531_v39 = vsel %vm355_vm1, %v835_v37, %v834_v36  ;;  %v1073_v37 = vld [vmem:[#allocation5 + $0x2b] ss:$0 sm:$0xff] }
 0x12c   :  { %v587_v5 = vmul.f32 %v1070_v16, %v1461_v35  ;;  %v588_v8 = vmul.f32 %v1070_v16, %v1465_v21  ;;  %v1078_v16 = vld [vmem:[#allocation5 + $0x30] ss:$0 sm:$0xff] }
 0x12d   :  { %695 = vrot.lane.b32.xlu0 %v1423_v18, %s1198_s1  ;;  %697 = vrot.lane.b32.xlu1 %v1421_v6, %s1198_s1 }
 0x131   :  { %708 = vrot.lane.b32.xlu0 %v1423_v18, %s1200_s7  ;;  %710 = vrot.lane.b32.xlu1 %v1421_v6, %s1200_s7 }
 0x135   :  { %721 = vrot.lane.b32.xlu0 %v1423_v18, %s1201_s8  ;;  %723 = vrot.lane.b32.xlu1 %v1421_v6, %s1201_s8 }
 0x139   :  { %743 = vrot.lane.b32.xlu0 %v1423_v18, %s1202_s9  ;;  %745 = vrot.lane.b32.xlu1 %v1421_v6, %s1202_s9 }
 0x13d   :  { %756 = vrot.lane.b32.xlu0 %v1423_v18, %s1203_s10  ;;  %758 = vrot.lane.b32.xlu1 %v1421_v6, %s1203_s10 }
 0x141   :  { %769 = vrot.lane.b32.xlu0 %v1423_v18, %s1204_s11  ;;  %771 = vrot.lane.b32.xlu1 %v1421_v6, %s1204_s11 }
 0x145   :  { %782 = vrot.lane.b32.xlu0 %v1423_v18, %s1205_s12  ;;  %784 = vrot.lane.b32.xlu1 %v1421_v6, %s1205_s12 }
 0x149   :  { %530 = vrot.lane.b32.xlu0 %v1461_v35, %s1199_s6  ;;  %532 = vrot.lane.b32.xlu1 %v1465_v21, %s1199_s6 }
 0x14d   :  { %543 = vrot.lane.b32.xlu0 %v1461_v35, %s1198_s1  ;;  %545 = vrot.lane.b32.xlu1 %v1465_v21, %s1198_s1 }
 0x151   :  { %556 = vrot.lane.b32.xlu0 %v1461_v35, %s1200_s7  ;;  %558 = vrot.lane.b32.xlu1 %v1465_v21, %s1200_s7 }
 0x155   :  { %569 = vrot.lane.b32.xlu0 %v1461_v35, %s1201_s8  ;;  %571 = vrot.lane.b32.xlu1 %v1465_v21, %s1201_s8 }
 0x159   :  { %591 = vrot.lane.b32.xlu0 %v1461_v35, %s1202_s9  ;;  %593 = vrot.lane.b32.xlu1 %v1465_v21, %s1202_s9 }
 0x15d   :  { %604 = vrot.lane.b32.xlu0 %v1461_v35, %s1203_s10  ;;  %606 = vrot.lane.b32.xlu1 %v1465_v21, %s1203_s10 }
 0x161   :  { %617 = vrot.lane.b32.xlu0 %v1461_v35, %s1204_s11  ;;  %619 = vrot.lane.b32.xlu1 %v1465_v21, %s1204_s11 }
 0x165   :  { %630 = vrot.lane.b32.xlu0 %v1461_v35, %s1205_s12  ;;  %632 = vrot.lane.b32.xlu1 %v1465_v21, %s1205_s12 }
 0x169   :  { %643 = vrot.lane.b32.xlu0 %v1461_v35, %s1206_s13  ;;  %645 = vrot.lane.b32.xlu1 %v1465_v21, %s1206_s13 }
 0x16d   :  { %656 = vrot.lane.b32.xlu0 %v1461_v35, %s1207_s14  ;;  %658 = vrot.lane.b32.xlu1 %v1465_v21, %s1207_s14 }
 0x171   :  { %669 = vrot.lane.b32.xlu0 %v1461_v35, %s1208_s15  ;;  %671 = vrot.lane.b32.xlu1 %v1465_v21, %s1208_s15 }
 0x175   :  { %795 = vrot.lane.b32.xlu0 %v1423_v18, %s1206_s13  ;;  %797 = vrot.lane.b32.xlu1 %v1421_v6, %s1206_s13 }
 0x179   :  { %808 = vrot.lane.b32.xlu0 %v1423_v18, %s1207_s14  ;;  %810 = vrot.lane.b32.xlu1 %v1421_v6, %s1207_s14 }
 0x17d   :  { %821 = vrot.lane.b32.xlu0 %v1423_v18, %s1208_s15  ;;  %823 = vrot.lane.b32.xlu1 %v1421_v6, %s1208_s15 }
 0x181   :  { %838 = vrot.lane.b32.xlu0 %v1527_v38, %s1199_s6  ;;  %840 = vrot.lane.b32.xlu1 %v1531_v39, %s1199_s6 }
 0x185   :  { %851 = vrot.lane.b32.xlu0 %v1527_v38, %s1198_s1  ;;  %853 = vrot.lane.b32.xlu1 %v1531_v39, %s1198_s1 }
 0x189   :  { %864 = vrot.lane.b32.xlu0 %v1527_v38, %s1200_s7  ;;  %866 = vrot.lane.b32.xlu1 %v1531_v39, %s1200_s7 }
 0x18d   :  { %877 = vrot.lane.b32.xlu0 %v1527_v38, %s1201_s8  ;;  %879 = vrot.lane.b32.xlu1 %v1531_v39, %s1201_s8 }
 0x191   :  { %899 = vrot.lane.b32.xlu0 %v1527_v38, %s1202_s9  ;;  %901 = vrot.lane.b32.xlu1 %v1531_v39, %s1202_s9 }
 0x195   :  { %912 = vrot.lane.b32.xlu0 %v1527_v38, %s1203_s10  ;;  %914 = vrot.lane.b32.xlu1 %v1531_v39, %s1203_s10 }
 0x199   :  { %925 = vrot.lane.b32.xlu0 %v1527_v38, %s1204_s11  ;;  %927 = vrot.lane.b32.xlu1 %v1531_v39, %s1204_s11 }
 0x19b   :  { %v1561_v1 = vpop.permute.xlu0 %682  ;;  %v1563_v3 = vpop.permute.xlu1 %684 }
 0x19d   :  { %938 = vrot.lane.b32.xlu0 %v1527_v38, %s1205_s12  ;;  %940 = vrot.lane.b32.xlu1 %v1531_v39, %s1205_s12 }
 0x19f   :  { %v1569_v42 = vpop.permute.xlu0 %695  ;;  %v1571_v2 = vpop.permute.xlu1 %697 }
 0x1a1   :  { %951 = vrot.lane.b32.xlu0 %v1527_v38, %s1206_s13  ;;  %953 = vrot.lane.b32.xlu1 %v1531_v39, %s1206_s13 }
 0x1a3   :  { %v1577_v43 = vpop.permute.xlu0 %708  ;;  %v1579_v24 = vpop.permute.xlu1 %710 }
 0x1a5   :  { %964 = vrot.lane.b32.xlu0 %v1527_v38, %s1207_s14  ;;  %966 = vrot.lane.b32.xlu1 %v1531_v39, %s1207_s14 }
 0x1a7   :  { %v1585_v25 = vpop.permute.xlu0 %721  ;;  %v1587_v44 = vpop.permute.xlu1 %723 }
 0x1a9   :  { %977 = vrot.lane.b32.xlu0 %v1527_v38, %s1208_s15  ;;  %979 = vrot.lane.b32.xlu1 %v1531_v39, %s1208_s15 }
 0x1ab   :  { %v1593_v10 = vpop.permute.xlu0 %743  ;;  %v1595_v45 = vpop.permute.xlu1 %745 }
 0x1af   :  { %v1597_v11 = vpop.permute.xlu0 %756  ;;  %v1599_v22 = vpop.permute.xlu1 %758 }
 0x1b3   :  { %v1601_v46 = vpop.permute.xlu0 %769  ;;  %v1603_v23 = vpop.permute.xlu1 %771 }
 0x1b7   :  { %v1605_v47 = vpop.permute.xlu0 %782  ;;  %v1607_v48 = vpop.permute.xlu1 %784 }
 0x1bb   :  { %v531_v51 = vpop.permute.xlu0 %530  ;;  %v533_v26 = vpop.permute.xlu1 %532 }
 0x1bc   :  { %v539_v63 = vmul.f32 %v1066_v56, %v531_v51  ;;  %v540_v40 = vmul.f32 %v1066_v56, %v533_v26  ;;  %v1075_v56 = vld [vmem:[#allocation5 + $0x2d] ss:$0 sm:$0xff] }
 0x1bf   :  { %v544_v27 = vpop.permute.xlu0 %543  ;;  %v546_v52 = vpop.permute.xlu1 %545 }
 0x1c0   :  { %v552_v60 = vmul.f32 %v1067_v29, %v544_v27  ;;  %v553_v32 = vmul.f32 %v1067_v29, %v546_v52 }
 0x1c2   :  { %v554_v4 = vadd.f32 %v552_v60, %v539_v63  ;;  %v555_v9 = vadd.f32 %v553_v32, %v540_v40 }
 0x1c3   :  { %v557_v53 = vpop.permute.xlu0 %556  ;;  %v559_v28 = vpop.permute.xlu1 %558 }
 0x1c4   :  { %v565_v41 = vmul.f32 %v1068_v57, %v557_v53  ;;  %v566_v0 = vmul.f32 %v1068_v57, %v559_v28  ;;  %v1074_v53 = vld [vmem:[#allocation5 + $0x2c] ss:$0 sm:$0xff] }
 0x1c6   :  { %v567_v14 = vadd.f32 %v565_v41, %v554_v4  ;;  %v568_v15 = vadd.f32 %v566_v0, %v555_v9 }
 0x1c7   :  { %v570_v54 = vpop.permute.xlu0 %569  ;;  %v572_v55 = vpop.permute.xlu1 %571 }
 0x1c8   :  { %v578_v12 = vmul.f32 %v1069_v33, %v570_v54  ;;  %v579_v13 = vmul.f32 %v1069_v33, %v572_v55 }
 0x1ca   :  { %v580_v58 = vadd.f32 %v578_v12, %v567_v14  ;;  %v581_v59 = vadd.f32 %v579_v13, %v568_v15 }
 0x1cb   :  { %v592_v61 = vpop.permute.xlu0 %591  ;;  %v594_v62 = vpop.permute.xlu1 %593 }
 0x1cc   :  { %v589_v31 = vadd.f32 %v587_v5, %v580_v58  ;;  %v600_v34 = vmul.f32 %v1071_v7, %v592_v61  ;;  %v590_v20 = vadd.f32 %v588_v8, %v581_v59  ;;  %v601_v36 = vmul.f32 %v1071_v7, %v594_v62  ;;  %v1076_v61 = vld [vmem:[#allocation5 + $0x2e] ss:$0 sm:$0xff]  ;;  %v1079_v8 = vld [vmem:[#allocation5 + $0x31] ss:$0 sm:$0xff] }
 0x1ce   :  { %v602_v28 = vadd.f32 %v600_v34, %v589_v31  ;;  %v603_v29 = vadd.f32 %v601_v36, %v590_v20  ;;  %v692_v31 = vmul.f32 %v1078_v16, %v1563_v3  ;;  %v1080_v36 = vld [vmem:[#allocation5 + $0x32] ss:$0 sm:$0xff] }
 0x1cf   :  { %v605_v49 = vpop.permute.xlu0 %604  ;;  %v607_v50 = vpop.permute.xlu1 %606 }
 0x1d0   :  { %v613_v27 = vmul.f32 %v1072_v30, %v605_v49  ;;  %v614_v52 = vmul.f32 %v1072_v30, %v607_v50  ;;  %v1077_v50 = vld [vmem:[#allocation5 + $0x2f] ss:$0 sm:$0xff]  ;;  %v691_v30 = vmul.f32 %v1078_v16, %v1561_v1  ;;  %v1087_v16 = vld [vmem:[#allocation5 + $0x39] ss:$0 sm:$0xff] }
 0x1d2   :  { %v615_v60 = vadd.f32 %v613_v27, %v602_v28  ;;  %v616_v21 = vadd.f32 %v614_v52, %v603_v29  ;;  %v705_v27 = vmul.f32 %v1079_v8, %v1571_v2  ;;  %v1081_v28 = vld [vmem:[#allocation5 + $0x33] ss:$0 sm:$0xff]  ;;  %v717_v29 = vmul.f32 %v1080_v36, %v1577_v43 }
 0x1d3   :  { %v618_v17 = vpop.permute.xlu0 %617  ;;  %v620_v19 = vpop.permute.xlu1 %619 }
 0x1d4   :  { %v626_v54 = vmul.f32 %v1073_v37, %v618_v17  ;;  %v627_v55 = vmul.f32 %v1073_v37, %v620_v19 }
 0x1d6   :  { %v628_v63 = vadd.f32 %v626_v54, %v615_v60  ;;  %v629_v62 = vadd.f32 %v627_v55, %v616_v21  ;;  %v718_v54 = vmul.f32 %v1080_v36, %v1579_v24  ;;  %v731_v60 = vmul.f32 %v1081_v28, %v1587_v44  ;;  %v1090_v36 = vld [vmem:[#allocation5 + $0x3c] ss:$0 sm:$0xff] }
 0x1d7   :  { %v631_v51 = vpop.permute.xlu0 %630  ;;  %v633_v26 = vpop.permute.xlu1 %632 }
 0x1d8   :  { %v639_v32 = vmul.f32 %v1074_v53, %v631_v51  ;;  %v640_v33 = vmul.f32 %v1074_v53, %v633_v26  ;;  %v704_v26 = vmul.f32 %v1079_v8, %v1569_v42 }
 0x1da   :  { %v641_v9 = vadd.f32 %v639_v32, %v628_v63  ;;  %v642_v12 = vadd.f32 %v640_v33, %v629_v62  ;;  %v1083_v32 = vld [vmem:[#allocation5 + $0x35] ss:$0 sm:$0xff]  ;;  %v1084_v63 = vld [vmem:[#allocation5 + $0x36] ss:$0 sm:$0xff] }
 0x1db   :  { %v644_v57 = vpop.permute.xlu0 %643  ;;  %v646_v35 = vpop.permute.xlu1 %645  ;;  %v765_v44 = vmul.f32 %v1084_v63, %v1597_v11 }
 0x1dc   :  { %v652_v40 = vmul.f32 %v1075_v56, %v644_v57  ;;  %v653_v41 = vmul.f32 %v1075_v56, %v646_v35  ;;  %v1082_v56 = vld [vmem:[#allocation5 + $0x34] ss:$0 sm:$0xff]  ;;  %v730_v35 = vmul.f32 %v1081_v28, %v1585_v25  ;;  %v1091_v28 = vld [vmem:[#allocation5 + $0x3d] ss:$0 sm:$0xff] }
 0x1dd   :  { %v740_v43 = vmul.f32 %v1082_v56, %v1421_v6 }
 0x1de   :  { %v654_v14 = vadd.f32 %v652_v40, %v641_v9  ;;  %v655_v15 = vadd.f32 %v653_v41, %v642_v12  ;;  %v752_v40 = vmul.f32 %v1083_v32, %v1593_v10  ;;  %v753_v41 = vmul.f32 %v1083_v32, %v1595_v45 }
 0x1df   :  { %v657_v0 = vpop.permute.xlu0 %656  ;;  %v659_v4 = vpop.permute.xlu1 %658  ;;  %v766_v9 = vmul.f32 %v1084_v63, %v1599_v22 }
 0x1e0   :  { %v665_v13 = vmul.f32 %v1076_v61, %v657_v0  ;;  %v666_v49 = vmul.f32 %v1076_v61, %v659_v4  ;;  %v739_v61 = vmul.f32 %v1082_v56, %v1423_v18  ;;  %v1085_v4 = vld [vmem:[#allocation5 + $0x37] ss:$0 sm:$0xff] }
 0x1e1   :  { %v778_v6 = vmul.f32 %v1085_v4, %v1601_v46 }
 0x1e2   :  { %v667_v7 = vadd.f32 %v665_v13, %v654_v14  ;;  %v668_v17 = vadd.f32 %v666_v49, %v655_v15  ;;  %v1086_v49 = vld [vmem:[#allocation5 + $0x38] ss:$0 sm:$0xff]  ;;  %v779_v14 = vmul.f32 %v1085_v4, %v1603_v23 }
 0x1e3   :  { %v670_v58 = vpop.permute.xlu0 %669  ;;  %v672_v59 = vpop.permute.xlu1 %671  ;;  %v791_v45 = vmul.f32 %v1086_v49, %v1605_v47 }
 0x1e4   :  { %v678_v19 = vmul.f32 %v1077_v50, %v670_v58  ;;  %v679_v5 = vmul.f32 %v1077_v50, %v672_v59  ;;  %v792_v58 = vmul.f32 %v1086_v49, %v1607_v48 }
 0x1e6   :  { %v680_v34 = vadd.f32 %v678_v19, %v667_v7  ;;  %v681_v20 = vadd.f32 %v679_v5, %v668_v17  ;;  %v1088_v7 = vld [vmem:[#allocation5 + $0x3a] ss:$0 sm:$0xff] }
 0x1e7   :  { %v796_v37 = vpop.permute.xlu0 %795  ;;  %v798_v51 = vpop.permute.xlu1 %797 }
 0x1e8   :  { %v693_v52 = vadd.f32 %v691_v30, %v680_v34  ;;  %v694_v53 = vadd.f32 %v692_v31, %v681_v20  ;;  %v804_v5 = vmul.f32 %v1087_v16, %v796_v37  ;;  %v805_v30 = vmul.f32 %v1087_v16, %v798_v51  ;;  %v1089_v31 = vld [vmem:[#allocation5 + $0x3b] ss:$0 sm:$0xff]  ;;  %v1092_v37 = vld [vmem:[#allocation5 + $0x3e] ss:$0 sm:$0xff] }
 0x1ea   :  { %v706_v55 = vadd.f32 %v704_v26, %v693_v52  ;;  %v707_v1 = vadd.f32 %v705_v27, %v694_v53 }
 0x1eb   :  { %v809_v3 = vpop.permute.xlu0 %808  ;;  %v811_v57 = vpop.permute.xlu1 %810 }
 0x1ec   :  { %v719_v21 = vadd.f32 %v717_v29, %v706_v55  ;;  %v720_v42 = vadd.f32 %v718_v54, %v707_v1  ;;  %v817_v23 = vmul.f32 %v1088_v7, %v809_v3  ;;  %v818_v20 = vmul.f32 %v1088_v7, %v811_v57  ;;  %v1093_v57 = vld [vmem:[#allocation5 + $0x3f] ss:$0 sm:$0xff] }
 0x1ee   :  { %v732_v2 = vadd.f32 %v730_v35, %v719_v21  ;;  %v733_v33 = vadd.f32 %v731_v60, %v720_v42 }
 0x1ef   :  { %v822_v24 = vpop.permute.xlu0 %821  ;;  %v824_v62 = vpop.permute.xlu1 %823 }
 0x1f0   :  { %v741_v0 = vadd.f32 %v739_v61, %v732_v2  ;;  %v742_v25 = vadd.f32 %v740_v43, %v733_v33  ;;  %v830_v48 = vmul.f32 %v1089_v31, %v822_v24  ;;  %v831_v53 = vmul.f32 %v1089_v31, %v824_v62 }
 0x1f2   :  { %v754_v12 = vadd.f32 %v752_v40, %v741_v0  ;;  %v755_v13 = vadd.f32 %v753_v41, %v742_v25  ;;  %v1094_v41 = vld [vmem:[#allocation5 + $0x40] ss:$0 sm:$0xff] }
 0x1f3   :  { %v839_v18 = vpop.permute.xlu0 %838  ;;  %v841_v50 = vpop.permute.xlu1 %840 }
 0x1f4   :  { %v767_v15 = vadd.f32 %v765_v44, %v754_v12  ;;  %v768_v10 = vadd.f32 %v766_v9, %v755_v13  ;;  %v847_v55 = vmul.f32 %v1090_v36, %v839_v18  ;;  %v848_v1 = vmul.f32 %v1090_v36, %v841_v50  ;;  %v1095_v13 = vld [vmem:[#allocation5 + $0x41] ss:$0 sm:$0xff] }
 0x1f5   :  { %v895_v9 = vmul.f32 %v1094_v41, %v1527_v38  ;;  %v896_v12 = vmul.f32 %v1094_v41, %v1531_v39 }
 0x1f6   :  { %v780_v59 = vadd.f32 %v778_v6, %v767_v15  ;;  %v781_v11 = vadd.f32 %v779_v14, %v768_v10  ;;  %v1096_v10 = vld [vmem:[#allocation5 + $0x42] ss:$0 sm:$0xff] }
 0x1f7   :  { %v852_v22 = vpop.permute.xlu0 %851  ;;  %v854_v17 = vpop.permute.xlu1 %853 }
 0x1f8   :  { %v793_v19 = vadd.f32 %v791_v45, %v780_v59  ;;  %v794_v8 = vadd.f32 %v792_v58, %v781_v11  ;;  %v860_v21 = vmul.f32 %v1091_v28, %v852_v22  ;;  %v861_v3 = vmul.f32 %v1091_v28, %v854_v17  ;;  %v1097_v58 = vld [vmem:[#allocation5 + $0x43] ss:$0 sm:$0xff]  ;;  %v1098_v17 = vld [vmem:[#allocation5 + $0x44] ss:$0 sm:$0xff] }
 0x1fa   :  { %v806_v46 = vadd.f32 %v804_v5, %v793_v19  ;;  %v807_v34 = vadd.f32 %v805_v30, %v794_v8  ;;  %v1099_v8 = vld [vmem:[#allocation5 + $0x45] ss:$0 sm:$0xff] }
 0x1fb   :  { %v865_v26 = vpop.permute.xlu0 %864  ;;  %v867_v27 = vpop.permute.xlu1 %866 }
 0x1fc   :  { %v819_v47 = vadd.f32 %v817_v23, %v806_v46  ;;  %v820_v52 = vadd.f32 %v818_v20, %v807_v34  ;;  %v873_v2 = vmul.f32 %v1092_v37, %v865_v26  ;;  %v874_v33 = vmul.f32 %v1092_v37, %v867_v27  ;;  %v1100_v23 = vld [vmem:[#allocation5 + $0x46] ss:$0 sm:$0xff] }
 0x1fe   :  { %v832_v29 = vadd.f32 %v830_v48, %v819_v47  ;;  %v833_v54 = vadd.f32 %v831_v53, %v820_v52 }
 0x1ff   :  { %v878_v56 = vpop.permute.xlu0 %877  ;;  %v880_v51 = vpop.permute.xlu1 %879 }
 0x200   :  { %v849_v35 = vadd.f32 %v847_v55, %v832_v29  ;;  %v850_v60 = vadd.f32 %v848_v1, %v833_v54  ;;  %v886_v62 = vmul.f32 %v1093_v57, %v878_v56  ;;  %v887_v40 = vmul.f32 %v1093_v57, %v880_v51  ;;  %v1101_v54 = vld [vmem:[#allocation5 + $0x47] ss:$0 sm:$0xff] }
 0x202   :  { %v862_v42 = vadd.f32 %v860_v21, %v849_v35  ;;  %v863_v32 = vadd.f32 %v861_v3, %v850_v60  ;;  %v1102_v3 = vld [vmem:[#allocation5 + $0x4a] ss:$0 sm:$0xff] }
 0x203   :  { %v900_v61 = vpop.permute.xlu0 %899  ;;  %v902_v43 = vpop.permute.xlu1 %901 }
 0x204   :  { %v875_v63 = vadd.f32 %v873_v2, %v862_v42  ;;  %v876_v24 = vadd.f32 %v874_v33, %v863_v32  ;;  %v908_v14 = vmul.f32 %v1095_v13, %v900_v61  ;;  %v909_v15 = vmul.f32 %v1095_v13, %v902_v43  ;;  %v1103_v32 = vld [vmem:[#allocation5 + $0x4b] ss:$0 sm:$0xff] }
 0x206   :  { %v888_v0 = vadd.f32 %v886_v62, %v875_v63  ;;  %v889_v25 = vadd.f32 %v887_v40, %v876_v24  ;;  %v1120_v63 = vld [vmem:[#allocation2] sm:$0xff]  ;;  %v1121_v62 = vld [vmem:[#allocation2 + $0x8] sm:$0xff] }
 0x207   :  { %v913_v4 = vpop.permute.xlu0 %912  ;;  %v915_v44 = vpop.permute.xlu1 %914 }
 0x208   :  { %v897_v49 = vadd.f32 %v895_v9, %v888_v0  ;;  %v898_v18 = vadd.f32 %v896_v12, %v889_v25  ;;  %v921_v7 = vmul.f32 %v1096_v10, %v913_v4  ;;  %v922_v22 = vmul.f32 %v1096_v10, %v915_v44 }
 0x20a   :  { %v910_v16 = vadd.f32 %v908_v14, %v897_v49  ;;  %v911_v45 = vadd.f32 %v909_v15, %v898_v18 }
 0x20b   :  { %v926_v50 = vpop.permute.xlu0 %925  ;;  %v928_v6 = vpop.permute.xlu1 %927 }
 0x20c   :  { %v923_v19 = vadd.f32 %v921_v7, %v910_v16  ;;  %v924_v38 = vadd.f32 %v922_v22, %v911_v45  ;;  %v934_v5 = vmul.f32 %v1097_v58, %v926_v50  ;;  %v935_v39 = vmul.f32 %v1097_v58, %v928_v6 }
 0x20e   :  { %v936_v20 = vadd.f32 %v934_v5, %v923_v19  ;;  %v937_v36 = vadd.f32 %v935_v39, %v924_v38 }
 0x20f   :  { %v939_v59 = vpop.permute.xlu0 %938  ;;  %v941_v11 = vpop.permute.xlu1 %940 }
 0x210   :  { %v947_v46 = vmul.f32 %v1098_v17, %v939_v59  ;;  %v948_v34 = vmul.f32 %v1098_v17, %v941_v11 }
 0x212   :  { %v949_v48 = vadd.f32 %v947_v46, %v936_v20  ;;  %v950_v53 = vadd.f32 %v948_v34, %v937_v36 }
 0x213   :  { %v952_v30 = vpop.permute.xlu0 %951  ;;  %v954_v31 = vpop.permute.xlu1 %953 }
 0x214   :  { %v960_v26 = vmul.f32 %v1099_v8, %v952_v30  ;;  %v961_v27 = vmul.f32 %v1099_v8, %v954_v31 }
 0x216   :  { %v962_v55 = vadd.f32 %v960_v26, %v949_v48  ;;  %v963_v1 = vadd.f32 %v961_v27, %v950_v53 }
 0x217   :  { %v965_v47 = vpop.permute.xlu0 %964  ;;  %v967_v52 = vpop.permute.xlu1 %966 }
 0x218   :  { %v973_v28 = vmul.f32 %v1100_v23, %v965_v47  ;;  %v974_v29 = vmul.f32 %v1100_v23, %v967_v52 }
 0x21a   :  { %v975_v51 = vadd.f32 %v973_v28, %v962_v55  ;;  %v976_v35 = vadd.f32 %v974_v29, %v963_v1 }
 0x21b   :  { %v978_v37 = vpop.permute.xlu0 %977  ;;  %v980_v56 = vpop.permute.xlu1 %979 }
 0x21c   :  { %v986_v60 = vmul.f32 %v1101_v54, %v978_v37  ;;  %v987_v21 = vmul.f32 %v1101_v54, %v980_v56 }
 0x21e   :  { %v988_v57 = vadd.f32 %v986_v60, %v975_v51  ;;  %v989_v42 = vadd.f32 %v987_v21, %v976_v35 }
 0x220   :  { %v995_v2 = vmul.f32 %v1102_v3, %v988_v57  ;;  %v996_v33 = vmul.f32 %v1102_v3, %v989_v42 }
 0x222   :  { %v1002_v61 = vadd.f32 %v1103_v32, %v995_v2  ;;  %v1003_v43 = vadd.f32 %v1103_v32, %v996_v33 }
 0x224   :  { %v1004_v24 = vadd.f32 %v1120_v63, %v1002_v61  ;;  %v1005_v40 = vadd.f32 %v1121_v62, %v1003_v43 }
 0x226   :  { %v1006_v41 = vmax.f32 %v1004_v24, 0.0  ;;  %v1007_v0 = vmax.f32 %v1005_v40, 0.0 }
 0x228   :  { %1008 = vst [vmem:[#allocation7] sm:$0xff] %v1006_v41  ;;  %1009 = vst [vmem:[#allocation7 + $0x8] sm:$0xff] %v1007_v0 }
 0x229   :  { %1177 = shalt.err (!%p1174_p6)
}
 0x22a   :  { %s1178_s23 = scalar_lea.hbm %s1648_s2, 256 }
 0x22b   :  { %p1179_p7 = scmp.ne.s32.totalorder %s1648_s2, %s1178_s23  ;;  %p1182_p8 = scmp.lt.u32.totalorder %s1178_s23, %s1648_s2 }
 0x22d   :  { %p1184_p9 = pnand %p1182_p8, %p1179_p7 }
 0x22f   :  { %1187 = shalt.err (!%p1184_p9)
}
 0x230   :  { %1021 = dma.vmem_to_hbm [thread:$0]  %s1016_s17, 256, %s1648_s2, [#allocation4], %s1195_s19, %s1195_s19, %s1196_s20  }
 0x231   :  { %1192 = dma.done.wait [#allocation4], 256  }
 0x232   :  { %1193 = vsyncadd [#allocation4], 4294967040 }
 0x233   :  { %1025 = vsyncpa [#allocation3], 1 }
 0x234   :  { %1026 = vsyncpa [#allocation6], 1 }
 0x235   :  { %1027 = vsyncpa [#allocation4], 1 }

</bundles_post_ra>
